<compile_context>
chip_gen: v7x
topology: tpu7x:2x2x1
jax: 0.10.0
libtpu: 0.0.40
codegen_flags: <defaults>
</compile_context>

<pallas_src>
import math
import jax
import jax.numpy as jnp
from jax import lax
from jax.experimental import pallas as pl
from jax.experimental.pallas import tpu as pltpu

# ----------------------------- config (small shapes) -----------------------------
BATCH = 4
SEQ = 16                    # seq_dim (== max_len of the positional encoding)
EMB = 128                   # embed_dim  (lane-dense)
HEADS = 4
HEAD_DIM = EMB // HEADS
FFN = 2 * EMB
LN_EPS = 1e-5

# Row layout of the small f32 (., EMB) slab.
R_POS = 0                                   # pos_embed rows [0, SEQ)
R_MASK = R_POS + SEQ                        # per-head 0/1 lane masks, HEADS rows
R_BO = R_MASK + HEADS                       # out-proj bias
R_GAMMA = R_BO + 1                          # LayerNorm weight
R_BETA = R_GAMMA + 1                        # LayerNorm bias
R_B2 = R_BETA + 1                           # FFN second-layer bias
PE_ROWS = R_B2 + 1                          # == 24, multiple of 8

# bf16 weight slabs (rows padded to a multiple of 16 for bf16 sublane packing).
QKV_ROWS = 144                              # Wqkv^T (128) + fused bias row (1) + pad
W1_ROWS = 144                               # W1^T (128) + b1 row (1) + pad
R_WO = 0                                    # Wo^T rows [0, EMB) of the (., EMB) slab
R_W2 = EMB                                  # W2^T rows [EMB, EMB+FFN)
WE_ROWS = EMB + FFN                         # 384


# ----------------------------------- kernel --------------------------------------
def temporal_attention_kernel(x_ref, pe_ref, wqkv_ref, w1_ref, we_ref, bm_ref, out_ref):
    f32, bf16 = jnp.float32, jnp.bfloat16
    n = x_ref.shape[0]                      # flattened rows in this block (= BB * SEQ)
    reps = n // SEQ

    x = x_ref[...]                                                  # (n, E) f32
    pos = pe_ref[R_POS:R_POS + SEQ, :]                              # (SEQ, E) f32
    # positional encoding per time step (broadcast over the batch items in the block)
    xp = (x.reshape(reps, SEQ, EMB) + pos[None, :, :]).reshape(n, EMB)
    xp_b = xp.astype(bf16)

    # Fused QKV projection: one (n,128)x(128,384) matmul; attention scale pre-folded
    # into Wq / bq on the host.
    qkv = jnp.dot(xp_b, wqkv_ref[0:EMB, :], preferred_element_type=f32)
    qkv = qkv + wqkv_ref[EMB:EMB + 1, :].astype(f32)
    q = qkv[:, 0:EMB]
    k = qkv[:, EMB:2 * EMB]
    v = qkv[:, 2 * EMB:3 * EMB]
    k_b = k.astype(bf16)

    bm = bm_ref[...]                                                # (n, n) additive mask
    masks = [pe_ref[R_MASK + h:R_MASK + h + 1, :] for h in range(HEADS)]

    # Per-head attention via precomputed lane masks; heads occupy disjoint lane ranges
    # so the masked per-head PV contributions sum to the concatenated output.
    # Phase 1: all score matmuls (back-to-back MXU pushes).
    scores = []
    for h in range(HEADS):
        qh = (q * masks[h]).astype(bf16)
        s = lax.dot_general(qh, k_b, (((1,), (1,)), ((), ())),
                            preferred_element_type=f32)             # (n, n)
        scores.append(s + bm)                                       # block-diag mask
    # Phase 2: softmaxes (XLU max/sum, EUP exp + approx reciprocal).
    probs = []
    for h in range(HEADS):
        s = scores[h]
        s = s - jnp.max(s, axis=-1, keepdims=True)
        p = jnp.exp(s)
        p = p * pl.reciprocal(jnp.sum(p, axis=-1, keepdims=True), approx=True)
        probs.append(p.astype(bf16))
    # Phase 3: PV matmuls, accumulated over heads in f32.
    o = jnp.zeros((n, EMB), f32)
    for h in range(HEADS):
        vh = (v * masks[h]).astype(bf16)
        o = o + jnp.dot(probs[h], vh, preferred_element_type=f32)

    attn = jnp.dot(o.astype(bf16), we_ref[R_WO:R_WO + EMB, :],
                   preferred_element_type=f32) + pe_ref[R_BO:R_BO + 1, :]

    gamma = pe_ref[R_GAMMA:R_GAMMA + 1, :]
    beta = pe_ref[R_BETA:R_BETA + 1, :]

    def layer_norm(t):
        mu = jnp.mean(t, axis=-1, keepdims=True)
        var = jnp.mean((t - mu) ** 2, axis=-1, keepdims=True)
        return (t - mu) * lax.rsqrt(var + LN_EPS) * gamma + beta

    x1 = layer_norm(xp + attn)

    # FFN is applied to xp (the pre-attention tensor), matching the PyTorch module.
    h1 = jnp.dot(xp_b, w1_ref[0:EMB, :], preferred_element_type=f32)
    h1 = jnp.maximum(h1 + w1_ref[EMB:EMB + 1, :].astype(f32), 0.0)
    x2 = jnp.dot(h1.astype(bf16), we_ref[R_W2:R_W2 + FFN, :],
                 preferred_element_type=f32) + pe_ref[R_B2:R_B2 + 1, :]

    out_ref[...] = layer_norm(x1 + x2)


# ----------------------------------- wrapper --------------------------------------
def _num_grid_blocks(batch):
    """1 step on single-TC chips (v5e/v6e); 2 steps on v7x so both TCs get work."""
    try:
        kind = jax.devices()[0].device_kind.lower()
    except Exception:
        kind = ""
    if ("v7" in kind or "tpu7" in kind) and batch % 2 == 0:
        return 2
    return 1


def temporal_attention_block(x, pE, w_qkv, w1, wE, bmask, *, num_blocks):
    """x: (B, T, E). Parameter slabs from pack_params(). Returns (B, T, E) f32."""
    B, T, E = x.shape
    n = (B // num_blocks) * T                       # flattened rows per grid step
    xf = x.reshape(B * T, E)

    grid_spec = pltpu.PrefetchScalarGridSpec(
        num_scalar_prefetch=0,
        grid=(num_blocks,),
        in_specs=[
            pl.BlockSpec((n, E), lambda b: (b, 0)),
            pl.BlockSpec(pE.shape, lambda b: (0, 0)),
            pl.BlockSpec(w_qkv.shape, lambda b: (0, 0)),
            pl.BlockSpec(w1.shape, lambda b: (0, 0)),
            pl.BlockSpec(wE.shape, lambda b: (0, 0)),
            pl.BlockSpec(bmask.shape, lambda b: (0, 0)),
        ],
        out_specs=pl.BlockSpec((n, E), lambda b: (b, 0)),
    )
    out = pl.pallas_call(
        temporal_attention_kernel,
        out_shape=jax.ShapeDtypeStruct((B * T, E), jnp.float32),
        grid_spec=grid_spec,
        compiler_params=pltpu.CompilerParams(dimension_semantics=("parallel",)),
    )(xf, pE, w_qkv, w1, wE, bmask)
    return out.reshape(B, T, E)


# ------------------------------ deterministic params -------------------------------
def init_params(key):
    ks = jax.random.split(key, 7)

    def linear(k, fan_in, fan_out):
        bound = 1.0 / math.sqrt(fan_in)
        kw, kb = jax.random.split(k)
        w = jax.random.uniform(kw, (fan_out, fan_in), jnp.float32, -bound, bound)
        b = jax.random.uniform(kb, (fan_out,), jnp.float32, -bound, bound)
        return w, b

    # nn.MultiheadAttention: xavier_uniform in_proj, zero in_proj bias, zero out_proj bias.
    lim = math.sqrt(6.0 / (EMB + EMB))
    wq = jax.random.uniform(ks[0], (EMB, EMB), jnp.float32, -lim, lim)
    wk = jax.random.uniform(ks[1], (EMB, EMB), jnp.float32, -lim, lim)
    wv = jax.random.uniform(ks[2], (EMB, EMB), jnp.float32, -lim, lim)
    bq = jnp.zeros((EMB,), jnp.float32)
    bk = jnp.zeros((EMB,), jnp.float32)
    bv = jnp.zeros((EMB,), jnp.float32)
    wo, _ = linear(ks[3], EMB, EMB)
    bo = jnp.zeros((EMB,), jnp.float32)
    w1, b1 = linear(ks[4], EMB, FFN)
    w2, b2 = linear(ks[5], FFN, EMB)
    gamma = jnp.ones((EMB,), jnp.float32)
    beta = jnp.zeros((EMB,), jnp.float32)
    # pos_embed is torch.randn in the module; scaled down to keep the bf16(MXU) vs
    # f32 XLA comparison numerically gentle.
    pos = 0.1 * jax.random.normal(ks[6], (SEQ, EMB), jnp.float32)

    return {
        "pos": pos,
        "wq_t": wq.T, "bq": bq, "wk_t": wk.T, "bk": bk, "wv_t": wv.T, "bv": bv,
        "wo_t": wo.T, "bo": bo,
        "w1_t": w1.T, "b1": b1, "w2_t": w2.T, "b2": b2,
        "gamma": gamma, "beta": beta,
    }


def pack_params(p, n_rows):
    """Host precompute: fold attention scale into Wq/bq, fuse QKV weights/biases,
    pack weights into lane-dense bf16 slabs and small f32 rows + block-diag mask."""
    scale = 1.0 / math.sqrt(HEAD_DIM)
    lane = jnp.arange(EMB)
    head_mask = (lane[None, :] // HEAD_DIM ==
                 jnp.arange(HEADS)[:, None]).astype(jnp.float32)       # (HEADS, EMB)

    pE = jnp.concatenate([
        p["pos"],                                                      # rows [0, SEQ)
        head_mask,                                                     # HEADS rows
        p["bo"][None, :], p["gamma"][None, :],
        p["beta"][None, :], p["b2"][None, :],
    ], axis=0)
    assert pE.shape == (PE_ROWS, EMB), pE.shape

    wqkv_t = jnp.concatenate([p["wq_t"] * scale, p["wk_t"], p["wv_t"]], axis=1)  # (E, 3E)
    bqkv = jnp.concatenate([p["bq"] * scale, p["bk"], p["bv"]])[None, :]         # (1, 3E)
    pad_q = jnp.zeros((QKV_ROWS - EMB - 1, 3 * EMB), jnp.float32)
    w_qkv = jnp.concatenate([wqkv_t, bqkv, pad_q], axis=0).astype(jnp.bfloat16)
    assert w_qkv.shape == (QKV_ROWS, 3 * EMB), w_qkv.shape

    pad_1 = jnp.zeros((W1_ROWS - EMB - 1, FFN), jnp.float32)
    w1 = jnp.concatenate([p["w1_t"], p["b1"][None, :], pad_1], axis=0).astype(jnp.bfloat16)
    assert w1.shape == (W1_ROWS, FFN), w1.shape

    wE = jnp.concatenate([p["wo_t"], p["w2_t"]], axis=0).astype(jnp.bfloat16)
    assert wE.shape == (WE_ROWS, EMB), wE.shape

    # Additive block-diagonal mask over the flattened (batch*time) rows of one block:
    # 0 within a batch item, -1e9 across batch items.
    ids = jnp.arange(n_rows) // SEQ
    bmask = jnp.where(ids[:, None] == ids[None, :], 0.0, -1e9).astype(jnp.float32)
    return pE, w_qkv, w1, wE, bmask


# --------------------------------- pure-JAX reference -------------------------------
def reference(x, p):
    xp = x + p["pos"][None]
    q = xp @ p["wq_t"] + p["bq"]
    k = xp @ p["wk_t"] + p["bk"]
    v = xp @ p["wv_t"] + p["bv"]
    B, T, E = x.shape
    qh = q.reshape(B, T, HEADS, HEAD_DIM)
    kh = k.reshape(B, T, HEADS, HEAD_DIM)
    vh = v.reshape(B, T, HEADS, HEAD_DIM)
    s = jnp.einsum("bthd,bshd->bhts", qh, kh) / math.sqrt(HEAD_DIM)
    w = jax.nn.softmax(s, axis=-1)
    o = jnp.einsum("bhts,bshd->bthd", w, vh).reshape(B, T, E)
    attn = o @ p["wo_t"] + p["bo"]

    def ln(t):
        mean = jnp.mean(t, -1, keepdims=True)
        var = jnp.mean((t - mean) ** 2, -1, keepdims=True)
        return (t - mean) / jnp.sqrt(var + LN_EPS) * p["gamma"] + p["beta"]

    x1 = ln(xp + attn)
    x2 = jnp.maximum(xp @ p["w1_t"] + p["b1"], 0.0) @ p["w2_t"] + p["b2"]
    return ln(x1 + x2)


if __name__ == "__main__":
    root = jax.random.PRNGKey(0)
    kx, kp = jax.random.split(root)
    x = 0.5 * jax.random.normal(kx, (BATCH, SEQ, EMB), jnp.float32)
    params = init_params(kp)

    num_blocks = _num_grid_blocks(BATCH)
    n_rows = (BATCH // num_blocks) * SEQ
    pE, w_qkv, w1, wE, bmask = pack_params(params, n_rows)

    out = temporal_attention_block(x, pE, w_qkv, w1, wE, bmask, num_blocks=num_blocks)
    out = jax.block_until_ready(out)

    ref = reference(x, params)
    assert out.shape == (BATCH, SEQ, EMB), out.shape
    err = float(jnp.max(jnp.abs(out - ref)))
    # kernel runs bf16-input / f32-accumulate matmuls; the f32 XLA reference uses
    # default TPU matmul precision, so allow a bf16-level tolerance.
    assert err < 5e-2, err
    print("KERNEL_OK")
</pallas_src>

<mosaic_0001>
module attributes {stable_mosaic.version = 11 : i64} {
  func.func @temporal_attention_kernel(%arg0: i32, %arg1: memref<64x128xf32, #tpu.memory_space<vmem>>, %arg2: memref<24x128xf32, #tpu.memory_space<vmem>>, %arg3: memref<144x384xbf16, #tpu.memory_space<vmem>>, %arg4: memref<144x256xbf16, #tpu.memory_space<vmem>>, %arg5: memref<384x128xbf16, #tpu.memory_space<vmem>>, %arg6: memref<64x64xf32, #tpu.memory_space<vmem>>, %arg7: memref<64x128xf32, #tpu.memory_space<vmem>>) attributes {dimension_semantics = [#tpu.dimension_semantics<parallel>], iteration_bounds = array<i64: 1>, scalar_prefetch = 0 : i64, scratch_operands = 0 : i64, tpu.core_type = #tpu.core_type<tc>, window_params = [{transform_indices = @transform_0, window_bounds = array<i64: 64, 128>}, {pipeline_mode = #tpu.pipeline_mode<synchronous>, transform_indices = @transform_1, window_bounds = array<i64: 24, 128>}, {pipeline_mode = #tpu.pipeline_mode<synchronous>, transform_indices = @transform_2, window_bounds = array<i64: 144, 384>}, {pipeline_mode = #tpu.pipeline_mode<synchronous>, transform_indices = @transform_3, window_bounds = array<i64: 144, 256>}, {pipeline_mode = #tpu.pipeline_mode<synchronous>, transform_indices = @transform_4, window_bounds = array<i64: 384, 128>}, {pipeline_mode = #tpu.pipeline_mode<synchronous>, transform_indices = @transform_5, window_bounds = array<i64: 64, 64>}, {transform_indices = @transform_6, window_bounds = array<i64: 64, 128>}]} {
    %c0 = arith.constant 0 : index
    %c0_0 = arith.constant 0 : index
    %0 = vector.load %arg1[%c0, %c0_0] : memref<64x128xf32, #tpu.memory_space<vmem>>, vector<64x128xf32>
    %c0_1 = arith.constant 0 : index
    %c0_2 = arith.constant 0 : index
    %1 = vector.load %arg2[%c0_1, %c0_2] : memref<24x128xf32, #tpu.memory_space<vmem>>, vector<16x128xf32>
    %2 = vector.shape_cast %0 : vector<64x128xf32> to vector<4x16x128xf32>
    %3 = vector.shape_cast %1 : vector<16x128xf32> to vector<1x16x128xf32>
    %4 = vector.broadcast %3 : vector<1x16x128xf32> to vector<4x16x128xf32>
    %5 = arith.addf %2, %4 : vector<4x16x128xf32>
    %6 = vector.shape_cast %5 : vector<4x16x128xf32> to vector<64x128xf32>
    %7 = arith.truncf %6 : vector<64x128xf32> to vector<64x128xbf16>
    %c0_3 = arith.constant 0 : index
    %c0_4 = arith.constant 0 : index
    %8 = vector.load %arg3[%c0_3, %c0_4] : memref<144x384xbf16, #tpu.memory_space<vmem>>, vector<128x384xbf16>
    %cst = arith.constant dense<0.000000e+00> : vector<64x384xf32>
    %9 = tpu.matmul %7, %8, %cst {dimension_numbers = #tpu.dot_dimension_numbers<[1], [0], [0], [1], [0, 0, 1, 1], [], []>} : vector<64x128xbf16>, vector<128x384xbf16>, vector<64x384xf32> -> vector<64x384xf32>
    %c128 = arith.constant 128 : index
    %c0_5 = arith.constant 0 : index
    %10 = vector.load %arg3[%c128, %c0_5] : memref<144x384xbf16, #tpu.memory_space<vmem>>, vector<1x384xbf16>
    %11 = arith.extf %10 : vector<1x384xbf16> to vector<1x384xf32>
    %12 = vector.broadcast %11 : vector<1x384xf32> to vector<64x384xf32>
    %13 = arith.addf %9, %12 : vector<64x384xf32>
    %14 = vector.extract_strided_slice %13 {offsets = [0, 0], sizes = [64, 128], strides = [1, 1]} : vector<64x384xf32> to vector<64x128xf32>
    %15 = vector.extract_strided_slice %13 {offsets = [0, 128], sizes = [64, 128], strides = [1, 1]} : vector<64x384xf32> to vector<64x128xf32>
    %16 = vector.extract_strided_slice %13 {offsets = [0, 256], sizes = [64, 128], strides = [1, 1]} : vector<64x384xf32> to vector<64x128xf32>
    %17 = arith.truncf %15 : vector<64x128xf32> to vector<64x128xbf16>
    %c0_6 = arith.constant 0 : index
    %c0_7 = arith.constant 0 : index
    %18 = vector.load %arg6[%c0_6, %c0_7] : memref<64x64xf32, #tpu.memory_space<vmem>>, vector<64x64xf32>
    %c16 = arith.constant 16 : index
    %c0_8 = arith.constant 0 : index
    %19 = vector.load %arg2[%c16, %c0_8] : memref<24x128xf32, #tpu.memory_space<vmem>>, vector<1x128xf32>
    %c17 = arith.constant 17 : index
    %c0_9 = arith.constant 0 : index
    %20 = vector.load %arg2[%c17, %c0_9] : memref<24x128xf32, #tpu.memory_space<vmem>>, vector<1x128xf32>
    %c18 = arith.constant 18 : index
    %c0_10 = arith.constant 0 : index
    %21 = vector.load %arg2[%c18, %c0_10] : memref<24x128xf32, #tpu.memory_space<vmem>>, vector<1x128xf32>
    %c19 = arith.constant 19 : index
    %c0_11 = arith.constant 0 : index
    %22 = vector.load %arg2[%c19, %c0_11] : memref<24x128xf32, #tpu.memory_space<vmem>>, vector<1x128xf32>
    %23 = vector.broadcast %19 : vector<1x128xf32> to vector<64x128xf32>
    %24 = arith.mulf %14, %23 : vector<64x128xf32>
    %25 = arith.truncf %24 : vector<64x128xf32> to vector<64x128xbf16>
    %cst_12 = arith.constant dense<0.000000e+00> : vector<64x64xf32>
    %26 = tpu.matmul %25, %17, %cst_12 {dimension_numbers = #tpu.dot_dimension_numbers<[1], [1], [0], [0], [0, 0, 1, 0], [], []>} : vector<64x128xbf16>, vector<64x128xbf16>, vector<64x64xf32> -> vector<64x64xf32>
    %27 = arith.addf %26, %18 : vector<64x64xf32>
    %28 = vector.broadcast %20 : vector<1x128xf32> to vector<64x128xf32>
    %29 = arith.mulf %14, %28 : vector<64x128xf32>
    %30 = arith.truncf %29 : vector<64x128xf32> to vector<64x128xbf16>
    %cst_13 = arith.constant dense<0.000000e+00> : vector<64x64xf32>
    %31 = tpu.matmul %30, %17, %cst_13 {dimension_numbers = #tpu.dot_dimension_numbers<[1], [1], [0], [0], [0, 0, 1, 0], [], []>} : vector<64x128xbf16>, vector<64x128xbf16>, vector<64x64xf32> -> vector<64x64xf32>
    %32 = arith.addf %31, %18 : vector<64x64xf32>
    %33 = vector.broadcast %21 : vector<1x128xf32> to vector<64x128xf32>
    %34 = arith.mulf %14, %33 : vector<64x128xf32>
    %35 = arith.truncf %34 : vector<64x128xf32> to vector<64x128xbf16>
    %cst_14 = arith.constant dense<0.000000e+00> : vector<64x64xf32>
    %36 = tpu.matmul %35, %17, %cst_14 {dimension_numbers = #tpu.dot_dimension_numbers<[1], [1], [0], [0], [0, 0, 1, 0], [], []>} : vector<64x128xbf16>, vector<64x128xbf16>, vector<64x64xf32> -> vector<64x64xf32>
    %37 = arith.addf %36, %18 : vector<64x64xf32>
    %38 = vector.broadcast %22 : vector<1x128xf32> to vector<64x128xf32>
    %39 = arith.mulf %14, %38 : vector<64x128xf32>
    %40 = arith.truncf %39 : vector<64x128xf32> to vector<64x128xbf16>
    %cst_15 = arith.constant dense<0.000000e+00> : vector<64x64xf32>
    %41 = tpu.matmul %40, %17, %cst_15 {dimension_numbers = #tpu.dot_dimension_numbers<[1], [1], [0], [0], [0, 0, 1, 0], [], []>} : vector<64x128xbf16>, vector<64x128xbf16>, vector<64x64xf32> -> vector<64x64xf32>
    %42 = arith.addf %41, %18 : vector<64x64xf32>
    %cst_16 = arith.constant dense<0xFF800000> : vector<64xf32>
    %43 = vector.multi_reduction <maximumf>, %27, %cst_16 [1] : vector<64x64xf32> to vector<64xf32>
    %44 = vector.shape_cast %43 : vector<64xf32> to vector<64x1xf32>
    %45 = vector.broadcast %44 : vector<64x1xf32> to vector<64x64xf32>
    %46 = arith.subf %27, %45 : vector<64x64xf32>
    %47 = math.exp %46 : vector<64x64xf32>
    %cst_17 = arith.constant dense<0.000000e+00> : vector<64xf32>
    %48 = vector.multi_reduction <add>, %47, %cst_17 [1] : vector<64x64xf32> to vector<64xf32>
    %49 = vector.shape_cast %48 : vector<64xf32> to vector<64x1xf32>
    %50 = tpu.reciprocal %49 {approx = true} : vector<64x1xf32> -> vector<64x1xf32>
    %51 = vector.broadcast %50 : vector<64x1xf32> to vector<64x64xf32>
    %52 = arith.mulf %47, %51 : vector<64x64xf32>
    %53 = arith.truncf %52 : vector<64x64xf32> to vector<64x64xbf16>
    %cst_18 = arith.constant dense<0xFF800000> : vector<64xf32>
    %54 = vector.multi_reduction <maximumf>, %32, %cst_18 [1] : vector<64x64xf32> to vector<64xf32>
    %55 = vector.shape_cast %54 : vector<64xf32> to vector<64x1xf32>
    %56 = vector.broadcast %55 : vector<64x1xf32> to vector<64x64xf32>
    %57 = arith.subf %32, %56 : vector<64x64xf32>
    %58 = math.exp %57 : vector<64x64xf32>
    %cst_19 = arith.constant dense<0.000000e+00> : vector<64xf32>
    %59 = vector.multi_reduction <add>, %58, %cst_19 [1] : vector<64x64xf32> to vector<64xf32>
    %60 = vector.shape_cast %59 : vector<64xf32> to vector<64x1xf32>
    %61 = tpu.reciprocal %60 {approx = true} : vector<64x1xf32> -> vector<64x1xf32>
    %62 = vector.broadcast %61 : vector<64x1xf32> to vector<64x64xf32>
    %63 = arith.mulf %58, %62 : vector<64x64xf32>
    %64 = arith.truncf %63 : vector<64x64xf32> to vector<64x64xbf16>
    %cst_20 = arith.constant dense<0xFF800000> : vector<64xf32>
    %65 = vector.multi_reduction <maximumf>, %37, %cst_20 [1] : vector<64x64xf32> to vector<64xf32>
    %66 = vector.shape_cast %65 : vector<64xf32> to vector<64x1xf32>
    %67 = vector.broadcast %66 : vector<64x1xf32> to vector<64x64xf32>
    %68 = arith.subf %37, %67 : vector<64x64xf32>
    %69 = math.exp %68 : vector<64x64xf32>
    %cst_21 = arith.constant dense<0.000000e+00> : vector<64xf32>
    %70 = vector.multi_reduction <add>, %69, %cst_21 [1] : vector<64x64xf32> to vector<64xf32>
    %71 = vector.shape_cast %70 : vector<64xf32> to vector<64x1xf32>
    %72 = tpu.reciprocal %71 {approx = true} : vector<64x1xf32> -> vector<64x1xf32>
    %73 = vector.broadcast %72 : vector<64x1xf32> to vector<64x64xf32>
    %74 = arith.mulf %69, %73 : vector<64x64xf32>
    %75 = arith.truncf %74 : vector<64x64xf32> to vector<64x64xbf16>
    %cst_22 = arith.constant dense<0xFF800000> : vector<64xf32>
    %76 = vector.multi_reduction <maximumf>, %42, %cst_22 [1] : vector<64x64xf32> to vector<64xf32>
    %77 = vector.shape_cast %76 : vector<64xf32> to vector<64x1xf32>
    %78 = vector.broadcast %77 : vector<64x1xf32> to vector<64x64xf32>
    %79 = arith.subf %42, %78 : vector<64x64xf32>
    %80 = math.exp %79 : vector<64x64xf32>
    %cst_23 = arith.constant dense<0.000000e+00> : vector<64xf32>
    %81 = vector.multi_reduction <add>, %80, %cst_23 [1] : vector<64x64xf32> to vector<64xf32>
    %82 = vector.shape_cast %81 : vector<64xf32> to vector<64x1xf32>
    %83 = tpu.reciprocal %82 {approx = true} : vector<64x1xf32> -> vector<64x1xf32>
    %84 = vector.broadcast %83 : vector<64x1xf32> to vector<64x64xf32>
    %85 = arith.mulf %80, %84 : vector<64x64xf32>
    %86 = arith.truncf %85 : vector<64x64xf32> to vector<64x64xbf16>
    %cst_24 = arith.constant 0.000000e+00 : f32
    %87 = vector.broadcast %cst_24 : f32 to vector<64x128xf32>
    %88 = vector.broadcast %19 : vector<1x128xf32> to vector<64x128xf32>
    %89 = arith.mulf %16, %88 : vector<64x128xf32>
    %90 = arith.truncf %89 : vector<64x128xf32> to vector<64x128xbf16>
    %cst_25 = arith.constant dense<0.000000e+00> : vector<64x128xf32>
    %91 = tpu.matmul %53, %90, %cst_25 {dimension_numbers = #tpu.dot_dimension_numbers<[1], [0], [0], [1], [0, 0, 1, 1], [], []>} : vector<64x64xbf16>, vector<64x128xbf16>, vector<64x128xf32> -> vector<64x128xf32>
    %92 = arith.addf %87, %91 : vector<64x128xf32>
    %93 = vector.broadcast %20 : vector<1x128xf32> to vector<64x128xf32>
    %94 = arith.mulf %16, %93 : vector<64x128xf32>
    %95 = arith.truncf %94 : vector<64x128xf32> to vector<64x128xbf16>
    %cst_26 = arith.constant dense<0.000000e+00> : vector<64x128xf32>
    %96 = tpu.matmul %64, %95, %cst_26 {dimension_numbers = #tpu.dot_dimension_numbers<[1], [0], [0], [1], [0, 0, 1, 1], [], []>} : vector<64x64xbf16>, vector<64x128xbf16>, vector<64x128xf32> -> vector<64x128xf32>
    %97 = arith.addf %92, %96 : vector<64x128xf32>
    %98 = vector.broadcast %21 : vector<1x128xf32> to vector<64x128xf32>
    %99 = arith.mulf %16, %98 : vector<64x128xf32>
    %100 = arith.truncf %99 : vector<64x128xf32> to vector<64x128xbf16>
    %cst_27 = arith.constant dense<0.000000e+00> : vector<64x128xf32>
    %101 = tpu.matmul %75, %100, %cst_27 {dimension_numbers = #tpu.dot_dimension_numbers<[1], [0], [0], [1], [0, 0, 1, 1], [], []>} : vector<64x64xbf16>, vector<64x128xbf16>, vector<64x128xf32> -> vector<64x128xf32>
    %102 = arith.addf %97, %101 : vector<64x128xf32>
    %103 = vector.broadcast %22 : vector<1x128xf32> to vector<64x128xf32>
    %104 = arith.mulf %16, %103 : vector<64x128xf32>
    %105 = arith.truncf %104 : vector<64x128xf32> to vector<64x128xbf16>
    %cst_28 = arith.constant dense<0.000000e+00> : vector<64x128xf32>
    %106 = tpu.matmul %86, %105, %cst_28 {dimension_numbers = #tpu.dot_dimension_numbers<[1], [0], [0], [1], [0, 0, 1, 1], [], []>} : vector<64x64xbf16>, vector<64x128xbf16>, vector<64x128xf32> -> vector<64x128xf32>
    %107 = arith.addf %102, %106 : vector<64x128xf32>
    %108 = arith.truncf %107 : vector<64x128xf32> to vector<64x128xbf16>
    %c0_29 = arith.constant 0 : index
    %c0_30 = arith.constant 0 : index
    %109 = vector.load %arg5[%c0_29, %c0_30] : memref<384x128xbf16, #tpu.memory_space<vmem>>, vector<128x128xbf16>
    %cst_31 = arith.constant dense<0.000000e+00> : vector<64x128xf32>
    %110 = tpu.matmul %108, %109, %cst_31 {dimension_numbers = #tpu.dot_dimension_numbers<[1], [0], [0], [1], [0, 0, 1, 1], [], []>} : vector<64x128xbf16>, vector<128x128xbf16>, vector<64x128xf32> -> vector<64x128xf32>
    %c20 = arith.constant 20 : index
    %c0_32 = arith.constant 0 : index
    %111 = vector.load %arg2[%c20, %c0_32] : memref<24x128xf32, #tpu.memory_space<vmem>>, vector<1x128xf32>
    %112 = vector.broadcast %111 : vector<1x128xf32> to vector<64x128xf32>
    %113 = arith.addf %110, %112 : vector<64x128xf32>
    %c21 = arith.constant 21 : index
    %c0_33 = arith.constant 0 : index
    %114 = vector.load %arg2[%c21, %c0_33] : memref<24x128xf32, #tpu.memory_space<vmem>>, vector<1x128xf32>
    %c22 = arith.constant 22 : index
    %c0_34 = arith.constant 0 : index
    %115 = vector.load %arg2[%c22, %c0_34] : memref<24x128xf32, #tpu.memory_space<vmem>>, vector<1x128xf32>
    %116 = arith.addf %6, %113 : vector<64x128xf32>
    %cst_35 = arith.constant dense<0.000000e+00> : vector<64xf32>
    %117 = vector.multi_reduction <add>, %116, %cst_35 [1] : vector<64x128xf32> to vector<64xf32>
    %118 = vector.shape_cast %117 : vector<64xf32> to vector<64x1xf32>
    %cst_36 = arith.constant 1.280000e+02 : f32
    %119 = vector.broadcast %cst_36 : f32 to vector<64x1xf32>
    %120 = arith.divf %118, %119 : vector<64x1xf32>
    %121 = vector.broadcast %120 : vector<64x1xf32> to vector<64x128xf32>
    %122 = arith.subf %116, %121 : vector<64x128xf32>
    %123 = arith.mulf %122, %122 : vector<64x128xf32>
    %cst_37 = arith.constant dense<0.000000e+00> : vector<64xf32>
    %124 = vector.multi_reduction <add>, %123, %cst_37 [1] : vector<64x128xf32> to vector<64xf32>
    %125 = vector.shape_cast %124 : vector<64xf32> to vector<64x1xf32>
    %cst_38 = arith.constant 1.280000e+02 : f32
    %126 = vector.broadcast %cst_38 : f32 to vector<64x1xf32>
    %127 = arith.divf %125, %126 : vector<64x1xf32>
    %128 = vector.broadcast %120 : vector<64x1xf32> to vector<64x128xf32>
    %129 = arith.subf %116, %128 : vector<64x128xf32>
    %cst_39 = arith.constant 9.99999974E-6 : f32
    %130 = vector.broadcast %cst_39 : f32 to vector<64x1xf32>
    %131 = arith.addf %127, %130 : vector<64x1xf32>
    %132 = math.rsqrt %131 : vector<64x1xf32>
    %133 = vector.broadcast %132 : vector<64x1xf32> to vector<64x128xf32>
    %134 = arith.mulf %129, %133 : vector<64x128xf32>
    %135 = vector.broadcast %114 : vector<1x128xf32> to vector<64x128xf32>
    %136 = arith.mulf %134, %135 : vector<64x128xf32>
    %137 = vector.broadcast %115 : vector<1x128xf32> to vector<64x128xf32>
    %138 = arith.addf %136, %137 : vector<64x128xf32>
    %c0_40 = arith.constant 0 : index
    %c0_41 = arith.constant 0 : index
    %139 = vector.load %arg4[%c0_40, %c0_41] : memref<144x256xbf16, #tpu.memory_space<vmem>>, vector<128x256xbf16>
    %cst_42 = arith.constant dense<0.000000e+00> : vector<64x256xf32>
    %140 = tpu.matmul %7, %139, %cst_42 {dimension_numbers = #tpu.dot_dimension_numbers<[1], [0], [0], [1], [0, 0, 1, 1], [], []>} : vector<64x128xbf16>, vector<128x256xbf16>, vector<64x256xf32> -> vector<64x256xf32>
    %c128_43 = arith.constant 128 : index
    %c0_44 = arith.constant 0 : index
    %141 = vector.load %arg4[%c128_43, %c0_44] : memref<144x256xbf16, #tpu.memory_space<vmem>>, vector<1x256xbf16>
    %142 = arith.extf %141 : vector<1x256xbf16> to vector<1x256xf32>
    %143 = vector.broadcast %142 : vector<1x256xf32> to vector<64x256xf32>
    %144 = arith.addf %140, %143 : vector<64x256xf32>
    %cst_45 = arith.constant 0.000000e+00 : f32
    %145 = vector.broadcast %cst_45 : f32 to vector<64x256xf32>
    %146 = arith.maximumf %144, %145 : vector<64x256xf32>
    %147 = arith.truncf %146 : vector<64x256xf32> to vector<64x256xbf16>
    %c128_46 = arith.constant 128 : index
    %c0_47 = arith.constant 0 : index
    %148 = vector.load %arg5[%c128_46, %c0_47] : memref<384x128xbf16, #tpu.memory_space<vmem>>, vector<256x128xbf16>
    %cst_48 = arith.constant dense<0.000000e+00> : vector<64x128xf32>
    %149 = tpu.matmul %147, %148, %cst_48 {dimension_numbers = #tpu.dot_dimension_numbers<[1], [0], [0], [1], [0, 0, 1, 1], [], []>} : vector<64x256xbf16>, vector<256x128xbf16>, vector<64x128xf32> -> vector<64x128xf32>
    %c23 = arith.constant 23 : index
    %c0_49 = arith.constant 0 : index
    %150 = vector.load %arg2[%c23, %c0_49] : memref<24x128xf32, #tpu.memory_space<vmem>>, vector<1x128xf32>
    %151 = vector.broadcast %150 : vector<1x128xf32> to vector<64x128xf32>
    %152 = arith.addf %149, %151 : vector<64x128xf32>
    %153 = arith.addf %138, %152 : vector<64x128xf32>
    %cst_50 = arith.constant dense<0.000000e+00> : vector<64xf32>
    %154 = vector.multi_reduction <add>, %153, %cst_50 [1] : vector<64x128xf32> to vector<64xf32>
    %155 = vector.shape_cast %154 : vector<64xf32> to vector<64x1xf32>
    %cst_51 = arith.constant 1.280000e+02 : f32
    %156 = vector.broadcast %cst_51 : f32 to vector<64x1xf32>
    %157 = arith.divf %155, %156 : vector<64x1xf32>
    %158 = vector.broadcast %157 : vector<64x1xf32> to vector<64x128xf32>
    %159 = arith.subf %153, %158 : vector<64x128xf32>
    %160 = arith.mulf %159, %159 : vector<64x128xf32>
    %cst_52 = arith.constant dense<0.000000e+00> : vector<64xf32>
    %161 = vector.multi_reduction <add>, %160, %cst_52 [1] : vector<64x128xf32> to vector<64xf32>
    %162 = vector.shape_cast %161 : vector<64xf32> to vector<64x1xf32>
    %cst_53 = arith.constant 1.280000e+02 : f32
    %163 = vector.broadcast %cst_53 : f32 to vector<64x1xf32>
    %164 = arith.divf %162, %163 : vector<64x1xf32>
    %165 = vector.broadcast %157 : vector<64x1xf32> to vector<64x128xf32>
    %166 = arith.subf %153, %165 : vector<64x128xf32>
    %cst_54 = arith.constant 9.99999974E-6 : f32
    %167 = vector.broadcast %cst_54 : f32 to vector<64x1xf32>
    %168 = arith.addf %164, %167 : vector<64x1xf32>
    %169 = math.rsqrt %168 : vector<64x1xf32>
    %170 = vector.broadcast %169 : vector<64x1xf32> to vector<64x128xf32>
    %171 = arith.mulf %166, %170 : vector<64x128xf32>
    %172 = vector.broadcast %114 : vector<1x128xf32> to vector<64x128xf32>
    %173 = arith.mulf %171, %172 : vector<64x128xf32>
    %174 = vector.broadcast %115 : vector<1x128xf32> to vector<64x128xf32>
    %175 = arith.addf %173, %174 : vector<64x128xf32>
    %c0_55 = arith.constant 0 : index
    %c0_56 = arith.constant 0 : index
    %176 = vector.load %arg7[%c0_55, %c0_56] : memref<64x128xf32, #tpu.memory_space<vmem>>, vector<64x128xf32>
    tpu.vector_store %arg7[%c0_55, %c0_56], %175 {strides = array<i32>} : memref<64x128xf32, #tpu.memory_space<vmem>>, vector<64x128xf32>,
    return
  }
  func.func @transform_0(%arg0: i32) -> (i32, i32) {
    %c0_i32 = arith.constant 0 : i32
    %c0_i32_0 = arith.constant 0 : i32
    return %arg0, %c0_i32 : i32, i32
  }
  func.func @transform_1(%arg0: i32) -> (i32, i32) {
    %c0_i32 = arith.constant 0 : i32
    %c0_i32_0 = arith.constant 0 : i32
    %c0_i32_1 = arith.constant 0 : i32
    return %c0_i32, %c0_i32_0 : i32, i32
  }
  func.func @transform_2(%arg0: i32) -> (i32, i32) {
    %c0_i32 = arith.constant 0 : i32
    %c0_i32_0 = arith.constant 0 : i32
    %c0_i32_1 = arith.constant 0 : i32
    return %c0_i32, %c0_i32_0 : i32, i32
  }
  func.func @transform_3(%arg0: i32) -> (i32, i32) {
    %c0_i32 = arith.constant 0 : i32
    %c0_i32_0 = arith.constant 0 : i32
    %c0_i32_1 = arith.constant 0 : i32
    return %c0_i32, %c0_i32_0 : i32, i32
  }
  func.func @transform_4(%arg0: i32) -> (i32, i32) {
    %c0_i32 = arith.constant 0 : i32
    %c0_i32_0 = arith.constant 0 : i32
    %c0_i32_1 = arith.constant 0 : i32
    return %c0_i32, %c0_i32_0 : i32, i32
  }
  func.func @transform_5(%arg0: i32) -> (i32, i32) {
    %c0_i32 = arith.constant 0 : i32
    %c0_i32_0 = arith.constant 0 : i32
    %c0_i32_1 = arith.constant 0 : i32
    return %c0_i32, %c0_i32_0 : i32, i32
  }
  func.func @transform_6(%arg0: i32) -> (i32, i32) {
    %c0_i32 = arith.constant 0 : i32
    %c0_i32_0 = arith.constant 0 : i32
    return %arg0, %c0_i32 : i32, i32
  }
}

</mosaic_0001>

<bundles_post_ra>
// kernel: tpu_custom_call.1
= control target key start
LH: loop header
LB: loop body
LE: loop exit
PB: predicated region body
PF: predicated region fallthrough
CT: control target
= control target key end

     0   :  { %11 = vsyncpa [#allocation3], 0  ;;  %s4246_s0 = inlined_call_operand.hbm [shape: f32[64,128], index: 0, kind: input, shape index: {}]   ;;  %s4247_s1 = inlined_call_operand.hbm [shape: f32[24,128], index: 1, kind: input, shape index: {}]   ;;  %s4248_s2 = inlined_call_operand.hbm [shape: bf16[144,384], index: 2, kind: input, shape index: {}]   ;;  %s4249_s3 = inlined_call_operand.hbm [shape: bf16[144,256], index: 3, kind: input, shape index: {}]   ;;  %s4250_s4 = inlined_call_operand.hbm [shape: bf16[384,128], index: 4, kind: input, shape index: {}]   ;;  %s4251_s5 = inlined_call_operand.hbm [shape: f32[64,64], index: 5, kind: input, shape index: {}]   ;;  %s4252_s6 = inlined_call_operand.hbm [shape: f32[64,128], index: 6, kind: output, shape index: {}]  }
   0x1   :  { %12 = vsyncpa [#allocation6], 0 }
   0x2   :  { %13 = vsyncpa [#allocation9], 0 }
   0x3   :  { %14 = vsyncpa [#allocation12], 0 }
   0x4   :  { %15 = vsyncpa [#allocation4], 0  ;;  %s3164_s21 = smov [#allocation5]   ;;  %s3165_s23 = smov [#allocation8]  }
   0x5   :  { %s33_s22 = sshll.u32 %s3164_s21, 4  ;;  %s57_s24 = sshll.u32 %s3165_s23, 4  ;;  %s34_s22 = int_to_ptr.vmem [resolvable:$true] %s33_s22  ;;  %s3213_s24 = int_to_ptr.vmem [resolvable:$true] %s57_s24 }
   0x6   :  { %s3000_s27 = scalar_lea.hbm %s4247_s1, 384 }
   0x7   :  { %p3001_p0 = scmp.ne.s32.totalorder %s4247_s1, %s3000_s27  ;;  %p3004_p1 = scmp.lt.u32.totalorder %s3000_s27, %s4247_s1 }
   0x9   :  { %p3006_p2 = pnand %p3004_p1, %p3001_p0 }
   0xb   :  { %3009 = shalt.err (!%p3006_p2)
}
   0xc   :  { %s3010_s8 = scalar_lea.vmem %s34_s22, 384  ;;  %p3015_p4 = scmp.lt.s32.totalorder %s34_s22, %s34_s22 }
   0xd   :  { %p3011_p3 = scmp.ne.s32.totalorder %s34_s22, %s3010_s8  ;;  %p3016_p5 = scmp.lt.s32.totalorder %s3010_s8, %s3010_s8 }
   0xf   :  { %p3017_p6 = por %p3016_p5, %p3015_p4 }
  0x11   :  { %p3018_p7 = pnand %p3017_p6, %p3011_p3 }
  0x13   :  { %3021 = shalt.err (!%p3018_p7)
}
  0x14   :  { %s3166_s9 = smov 128   ;;  %s3167_s10 = smov 8  }
  0x15   :  { %39 = dma.hbm_to_vmem [thread:$0]  %s4247_s1, 384, %s34_s22, [#allocation6], %s3166_s9, %s3166_s9, %s3167_s10  }
  0x16   :  { %s3022_s15 = scalar_lea.hbm %s4249_s3, 2304 }
  0x17   :  { %p3023_p8 = scmp.ne.s32.totalorder %s4249_s3, %s3022_s15  ;;  %p3026_p9 = scmp.lt.u32.totalorder %s3022_s15, %s4249_s3 }
  0x19   :  { %p3028_p10 = pnand %p3026_p9, %p3023_p8 }
  0x1b   :  { %3031 = shalt.err (!%p3028_p10)
}
  0x1c   :  { %s3032_s20 = scalar_lea.vmem %s3213_s24, 2304  ;;  %p3037_p12 = scmp.lt.s32.totalorder %s3213_s24, %s3213_s24 }
  0x1d   :  { %p3033_p11 = scmp.ne.s32.totalorder %s3213_s24, %s3032_s20  ;;  %p3038_p13 = scmp.lt.s32.totalorder %s3032_s20, %s3032_s20 }
  0x1f   :  { %p3039_p0 = por %p3038_p13, %p3037_p12 }
  0x21   :  { %p3040_p1 = pnand %p3039_p0, %p3033_p11 }
  0x23   :  { %3043 = shalt.err (!%p3040_p1)
}
  0x24   :  { %63 = dma.hbm_to_vmem [thread:$0]  %s4249_s3, 2304, %s3213_s24, [#allocation9], %s3166_s9, %s3166_s9, %s3167_s10  }
  0x25   :  { %s3168_s22 = smov [#allocation2]   ;;  %s3169_s25 = smov [#allocation7]  }
  0x26   :  { %s21_s23 = sshll.u32 %s3168_s22, 4  ;;  %s45_s26 = sshll.u32 %s3169_s25, 4  ;;  %s22_s23 = int_to_ptr.vmem [resolvable:$true] %s21_s23  ;;  %s3250_s26 = int_to_ptr.vmem [resolvable:$true] %s45_s26 }
  0x27   :  { %s3044_s29 = scalar_lea.hbm %s4246_s0, 1024 }
  0x28   :  { %p3045_p2 = scmp.ne.s32.totalorder %s4246_s0, %s3044_s29  ;;  %p3048_p3 = scmp.lt.u32.totalorder %s3044_s29, %s4246_s0 }
  0x2a   :  { %p3050_p4 = pnand %p3048_p3, %p3045_p2 }
  0x2c   :  { %3053 = shalt.err (!%p3050_p4)
}
  0x2d   :  { %s3054_s3 = scalar_lea.vmem %s22_s23, 1024  ;;  %p3059_p6 = scmp.lt.s32.totalorder %s22_s23, %s22_s23 }
  0x2e   :  { %p3055_p5 = scmp.ne.s32.totalorder %s22_s23, %s3054_s3  ;;  %p3060_p7 = scmp.lt.s32.totalorder %s3054_s3, %s3054_s3 }
  0x30   :  { %p3061_p8 = por %p3060_p7, %p3059_p6 }
  0x32   :  { %p3062_p9 = pnand %p3061_p8, %p3055_p5 }
  0x34   :  { %3065 = shalt.err (!%p3062_p9)
}
  0x35   :  { %27 = dma.hbm_to_vmem [thread:$0]  %s4246_s0, 1024, %s22_s23, [#allocation3], %s3166_s9, %s3166_s9, %s3167_s10  }
  0x36   :  { %s3066_s15 = scalar_lea.hbm %s4248_s2, 3456 }
  0x37   :  { %p3067_p10 = scmp.ne.s32.totalorder %s4248_s2, %s3066_s15  ;;  %p3070_p11 = scmp.lt.u32.totalorder %s3066_s15, %s4248_s2 }
  0x39   :  { %p3072_p12 = pnand %p3070_p11, %p3067_p10 }
  0x3b   :  { %3075 = shalt.err (!%p3072_p12)
}
  0x3c   :  { %s3076_s20 = scalar_lea.vmem %s3250_s26, 3456  ;;  %p3081_p0 = scmp.lt.s32.totalorder %s3250_s26, %s3250_s26 }
  0x3d   :  { %p3077_p13 = scmp.ne.s32.totalorder %s3250_s26, %s3076_s20  ;;  %p3082_p1 = scmp.lt.s32.totalorder %s3076_s20, %s3076_s20 }
  0x3f   :  { %p3083_p2 = por %p3082_p1, %p3081_p0 }
  0x41   :  { %p3084_p3 = pnand %p3083_p2, %p3077_p13 }
  0x43   :  { %3087 = shalt.err (!%p3084_p3)
}
  0x44   :  { %s3170_s0 = smov 192   ;;  %s3171_s1 = smov 12  }
  0x45   :  { %51 = dma.hbm_to_vmem [thread:$0]  %s4248_s2, 3456, %s3250_s26, [#allocation6], %s3170_s0, %s3170_s0, %s3171_s1  }
  0x46   :  { %s3172_s23 = smov [#allocation10]   ;;  %s3088_s29 = scalar_lea.hbm %s4250_s4, 3072 }
  0x47   :  { %s69_s25 = sshll.u32 %s3172_s23, 4  ;;  %p3089_p4 = scmp.ne.s32.totalorder %s4250_s4, %s3088_s29  ;;  %s70_s25 = int_to_ptr.vmem [resolvable:$true] %s69_s25 }
  0x48   :  { %p3092_p5 = scmp.lt.u32.totalorder %s3088_s29, %s4250_s4 }
  0x4a   :  { %p3094_p6 = pnand %p3092_p5, %p3089_p4 }
  0x4c   :  { %3097 = shalt.err (!%p3094_p6)
}
  0x4d   :  { %s3098_s3 = scalar_lea.vmem %s70_s25, 3072  ;;  %p3103_p8 = scmp.lt.s32.totalorder %s70_s25, %s70_s25 }
  0x4e   :  { %p3099_p7 = scmp.ne.s32.totalorder %s70_s25, %s3098_s3  ;;  %p3104_p9 = scmp.lt.s32.totalorder %s3098_s3, %s3098_s3 }
  0x50   :  { %p3105_p10 = por %p3104_p9, %p3103_p8 }
  0x52   :  { %p3106_p11 = pnand %p3105_p10, %p3099_p7 }
  0x54   :  { %3109 = shalt.err (!%p3106_p11)
}
  0x55   :  { %s3173_s2 = smov 64   ;;  %s3174_s26 = smov 4  }
  0x56   :  { %75 = dma.hbm_to_vmem [thread:$0]  %s4250_s4, 3072, %s70_s25, [#allocation9], %s3173_s2, %s3173_s2, %s3174_s26  }
  0x57   :  { %s3175_s13 = smov [#allocation11]   ;;  %s3110_s17 = scalar_lea.hbm %s4251_s5, 1024 }
  0x58   :  { %s81_s14 = sshll.u32 %s3175_s13, 4  ;;  %p3111_p12 = scmp.ne.s32.totalorder %s4251_s5, %s3110_s17  ;;  %s82_s14 = int_to_ptr.vmem [resolvable:$true] %s81_s14 }
  0x59   :  { %p3114_p13 = scmp.lt.u32.totalorder %s3110_s17, %s4251_s5 }
  0x5b   :  { %p3116_p0 = pnand %p3114_p13, %p3111_p12 }
  0x5d   :  { %3119 = shalt.err (!%p3116_p0)
}
  0x5e   :  { %s3120_s1 = scalar_lea.vmem %s82_s14, 1024  ;;  %p3125_p2 = scmp.lt.s32.totalorder %s82_s14, %s82_s14 }
  0x5f   :  { %p3121_p1 = scmp.ne.s32.totalorder %s82_s14, %s3120_s1  ;;  %p3126_p3 = scmp.lt.s32.totalorder %s3120_s1, %s3120_s1 }
  0x61   :  { %p3127_p4 = por %p3126_p3, %p3125_p2 }
  0x63   :  { %p3128_p5 = pnand %p3127_p4, %p3121_p1 }
  0x65   :  { %3131 = shalt.err (!%p3128_p5)
}
  0x66   :  { %87 = dma.hbm_to_vmem [thread:$0]  %s4251_s5, 1024, %s82_s14, [#allocation12], %s3166_s9, %s3166_s9, %s3167_s10  }
  0x67   :  { %3154 = dma.done.wait [#allocation3], 1024  }
  0x68   :  { %3155 = vsyncadd [#allocation3], 4294966272 }
  0x69   :  { %3156 = dma.done.wait [#allocation6], 3840  }
  0x6a   :  { %3157 = vsyncadd [#allocation6], 4294963456 }
  0x6b   :  { %3158 = dma.done.wait [#allocation9], 5376  }
  0x6c   :  { %3159 = vsyncadd [#allocation9], 4294961920 }
  0x6d   :  { %3160 = dma.done.wait [#allocation12], 1024  }
  0x6e   :  { %3161 = vsyncadd [#allocation12], 4294966272  ;;  %v4253_v0 = vmov 0   ;;  %v2758_v1 = vld [vmem:[#allocation7 + $0x4] ss:$12 sps:$4 sm:$0xff]   ;;  %v107_v9 = vld [vmem:[#allocation2] sm:$0xff]  ;;  %v166_v47 = vlaneseq }
  0x6f   :  { %338 = vmatprep.mubr.bf16.mxu0 %v4253_v0  ;;  %v2760_v2 = vld [vmem:[#allocation7] ss:$12 sps:$4 sm:$0xff]   ;;  %306 = vmatprep.subr.bf16.mxu0 %v2758_v1  ;;  %v2761_v3 = vld [vmem:[#allocation7 + $0x1c] ss:$12 sps:$4 sm:$0xff]   ;;  %v2763_v4 = vld [vmem:[#allocation7 + $0x18] ss:$12 sps:$4 sm:$0xff]  }
  0x70   :  { %307 = vmatpush1.bf16.msra.mxu0 %v2760_v2  ;;  %v2764_v5 = vld [vmem:[#allocation7 + $0x34] ss:$12 sps:$4 sm:$0xff]   ;;  %v2766_v6 = vld [vmem:[#allocation7 + $0x30] ss:$12 sps:$4 sm:$0xff]   ;;  %v2767_v7 = vld [vmem:[#allocation7 + $0x4c] ss:$12 sps:$4 sm:$0xff]  }
  0x71   :  { %308 = vmatprep.subr.bf16.mxu0 %v2761_v3  ;;  %v2769_v8 = vld [vmem:[#allocation7 + $0x48] ss:$12 sps:$4 sm:$0xff]   ;;  %v2770_v13 = vld [vmem:[#allocation7 + $0x64] ss:$12 sps:$4 sm:$0xff]   ;;  %v2772_v16 = vld [vmem:[#allocation7 + $0x60] ss:$12 sps:$4 sm:$0xff]  }
  0x72   :  { %v108_v10 = vld [vmem:[#allocation2 + $0x8] sm:$0xff]  ;;  %v3312_v11 = vld [vmem:[#allocation5] sm:$0xff]  ;;  %v2784_v21 = vld [vmem:[#allocation7 + $0x38] ss:$12 sps:$4 sm:$0xff]   ;;  %v167_v48 = vshrl.u32 %v166_v47, 7  ;;  %vm784_vm0 = vcmask 523264  }
  0x73   :  { %v3314_v12 = vld [vmem:[#allocation5 + $0x8] sm:$0xff]  ;;  %v3317_v14 = vadd.f32 %v3312_v11, %v107_v9  ;;  %v2783_v19 = vld [vmem:[#allocation7 + $0x20] ss:$12 sps:$4 sm:$0xff]   ;;  %v2773_v20 = vld [vmem:[#allocation7 + $0x7c] ss:$12 sps:$4 sm:$0xff]   ;;  %s3177_s5 = smov [#allocation13]  }
  0x74   :  { %309 = vmatpush1.bf16.msra.mxu0 %v2763_v4  ;;  %v3320_v15 = vadd.f32 %v3314_v12, %v108_v10  ;;  %v2782_v17 = vld [vmem:[#allocation7 + $0x8] ss:$12 sps:$4 sm:$0xff]   ;;  %v2775_v22 = vld [vmem:[#allocation7 + $0x78] ss:$12 sps:$4 sm:$0xff]   ;;  %v2778_v24 = vld [vmem:[#allocation7 + $0x90] ss:$12 sps:$4 sm:$0xff]  }
  0x75   :  { %310 = vmatprep.subr.bf16.mxu0 %v2764_v5  ;;  %4265 = vst [vmem:[#allocation19_spill] sm:$0xff] %v3317_v14  ;;  %2544 = vmatprep.subr.bf16.mxu1 %v2782_v17  ;;  %v2776_v23 = vld [vmem:[#allocation7 + $0x94] ss:$12 sps:$4 sm:$0xff]   ;;  %v2779_v25 = vld [vmem:[#allocation7 + $0xac] ss:$12 sps:$4 sm:$0xff]   ;;  %v3367_v51 = vsub.s32 0, %v167_v48 }
  0x76   :  { %4266 = vst [vmem:[#allocation20_spill] sm:$0xff] %v3320_v15  ;;  %v3324_v18 = vpack.c.bf16 %v3320_v15, %v3317_v14  ;;  %2545 = vmatpush3.bf16.msra.mxu1 %v2782_v17  ;;  %v2785_v26 = vld [vmem:[#allocation7 + $0x50] ss:$12 sps:$4 sm:$0xff]   ;;  %v2786_v27 = vld [vmem:[#allocation7 + $0x68] ss:$12 sps:$4 sm:$0xff]   ;;  %v110_v31 = vld [vmem:[#allocation2 + $0x18] sm:$0xff] }
  0x77   :  { %2546 = vmatprep.subr.bf16.mxu1 %v2783_v19  ;;  %v2781_v28 = vld [vmem:[#allocation7 + $0xa8] ss:$12 sps:$4 sm:$0xff]   ;;  %v2787_v29 = vld [vmem:[#allocation7 + $0x80] ss:$12 sps:$4 sm:$0xff]   ;;  %v109_v30 = vld [vmem:[#allocation2 + $0x10] sm:$0xff]  ;;  %v3332_v34 = vadd.f32 %v3314_v12, %v110_v31  ;;  %4273 = vst [vmem:[#allocation27_spill] sm:$0xff] %v3367_v51 }
  0x78   :  { %311 = vmatpush1.bf16.msra.mxu0 %v2766_v6  ;;  %2560 = vmatprep.mubr.bf16.mxu1 %v3324_v18  ;;  %v2788_v32 = vld [vmem:[#allocation7 + $0x98] ss:$12 sps:$4 sm:$0xff]   ;;  %v3329_v33 = vadd.f32 %v3312_v11, %v109_v30  ;;  %v2789_v35 = vld [vmem:[#allocation7 + $0xb0] ss:$12 sps:$4 sm:$0xff]   ;;  %v111_v36 = vld [vmem:[#allocation2 + $0x20] sm:$0xff]  ;;  %s2313_s22 = sshll.u32 %s3177_s5, 4  ;;  %s2314_s22 = int_to_ptr.vmem [resolvable:$true] %s2313_s22 }
  0x79   :  { %312 = vmatprep.subr.bf16.mxu0 %v2767_v7  ;;  %4268 = vst [vmem:[#allocation22_spill] sm:$0xff] %v3332_v34  ;;  %v112_v37 = vld [vmem:[#allocation2 + $0x28] sm:$0xff]  ;;  %v3341_v39 = vadd.f32 %v3312_v11, %v111_v36  ;;  %v113_v42 = vld [vmem:[#allocation2 + $0x30] sm:$0xff]  ;;  %v114_v43 = vld [vmem:[#allocation2 + $0x38] sm:$0xff]  ;;  %s3132_s23 = scalar_lea.vmem %s2314_s22, 1024  ;;  %p3137_p7 = scmp.lt.s32.totalorder %s2314_s22, %s2314_s22 }
  0x7a   :  { %2547 = vmatpush3.bf16.msra.mxu1 %v2783_v19  ;;  %4267 = vst [vmem:[#allocation21_spill] sm:$0xff] %v3329_v33  ;;  %v3337_v38 = vpack.c.bf16 %v3332_v34, %v3329_v33  ;;  %v3344_v40 = vadd.f32 %v3314_v12, %v112_v37  ;;  %v3355_v44 = vadd.f32 %v3312_v11, %v113_v42  ;;  %v161_v49 = vld [vmem:[#allocation7 + $0xc0] sm:$0x11]  ;;  %v3375_v56 = vld [vmem:[#allocation5 + $0x10] ss:$0 sm:$0xff]  ;;  %p3133_p6 = scmp.ne.s32.totalorder %s2314_s22, %s3132_s23  ;;  %p3138_p8 = scmp.lt.s32.totalorder %s3132_s23, %s3132_s23 }
  0x7b   :  { %2548 = vmatprep.subr.bf16.mxu1 %v2784_v21  ;;  %4269 = vst [vmem:[#allocation23_spill] sm:$0xff] %v3341_v39  ;;  %v3358_v45 = vadd.f32 %v3314_v12, %v114_v43  ;;  %v163_v50 = vunpack.c.l.bf16 %v161_v49  ;;  %v164_v52 = vunpack.c.h.bf16 %v161_v49  ;;  %v3377_v57 = vld [vmem:[#allocation5 + $0x11] ss:$0 sm:$0xff]  ;;  %v3380_v60 = vld [vmem:[#allocation5 + $0x12] ss:$0 sm:$0xff] }
  0x7c   :  { %313 = vmatpush1.bf16.msra.mxu0 %v2769_v8  ;;  %4270 = vst [vmem:[#allocation24_spill] sm:$0xff] %v3344_v40  ;;  %v3349_v41 = vpack.c.bf16 %v3344_v40, %v3341_v39  ;;  %4271 = vst [vmem:[#allocation25_spill] sm:$0xff] %v3355_v44  ;;  %v3382_v61 = vld [vmem:[#allocation5 + $0x13] ss:$0 sm:$0xff]  ;;  %p3139_p9 = por %p3138_p8, %p3137_p7 }
  0x7d   :  { %314 = vmatprep.subr.bf16.mxu0 %v2770_v13  ;;  %4272 = vst [vmem:[#allocation26_spill] sm:$0xff] %v3358_v45  ;;  %v3363_v46 = vpack.c.bf16 %v3358_v45, %v3355_v44  ;;  %v3370_v53 = vrot.slane %v163_v50, %v3367_v51  ;;  %v3373_v54 = vrot.slane %v164_v52, %v3367_v51 }
  0x7e   :  { %2549 = vmatpush3.bf16.msra.mxu1 %v2784_v21  ;;  %p3140_p10 = pnand %p3139_p9, %p3133_p6 }
  0x7f   :  { %2550 = vmatprep.subr.bf16.mxu1 %v2785_v26 }
  0x80   :  { %315 = vmatpush1.bf16.msra.mxu0 %v2772_v16 }
  0x81   :  { %316 = vmatprep.subr.bf16.mxu0 %v2773_v20 }
  0x82   :  { %2551 = vmatpush3.bf16.msra.mxu1 %v2785_v26 }
  0x83   :  { %2552 = vmatprep.subr.bf16.mxu1 %v2786_v27 }
  0x84   :  { %317 = vmatpush1.bf16.msra.mxu0 %v2775_v22 }
  0x85   :  { %318 = vmatprep.subr.bf16.mxu0 %v2776_v23 }
  0x86   :  { %2553 = vmatpush3.bf16.msra.mxu1 %v2786_v27 }
  0x87   :  { %2554 = vmatprep.subr.bf16.mxu1 %v2787_v29 }
  0x88   :  { %319 = vmatpush1.bf16.msra.mxu0 %v2778_v24 }
  0x89   :  { %320 = vmatprep.subr.bf16.mxu0 %v2779_v25 }
  0x8a   :  { %2555 = vmatpush3.bf16.msra.mxu1 %v2787_v29 }
  0x8b   :  { %2556 = vmatprep.subr.bf16.mxu1 %v2788_v32 }
  0x8c   :  { %321 = vmatpush1.bf16.msra.mxu0 %v2781_v28 }
  0x8e   :  { %2557 = vmatpush3.bf16.msra.mxu1 %v2788_v32 }
  0x8f   :  { %339 = vmatmul.mubr.bf16.vlgmr.msra.gmra.mrb[0].mxu0 %v3324_v18  ;;  %2558 = vmatprep.subr.bf16.mxu1 %v2789_v35 }
  0x90   :  { %348 = vmatprep.mubr.bf16.mxu0 %v4253_v0 }
  0x92   :  { %2559 = vmatpush3.bf16.msra.mxu1 %v2789_v35 }
  0x95   :  { %2561 = vmatmul.mubr.bf16.vlgmr.msra.gmra.mrb[0].mxu1 %v3337_v38 }
  0x96   :  { %2564 = vmatprep.mubr.bf16.mxu1 %v3349_v41 }
  0x97   :  { %349 = vmatmul.mubr.bf16.gmra.mrb[4].mxu0 %v3337_v38 }
  0x98   :  { %358 = vmatprep.mubr.bf16.mxu0 %v4253_v0 }
  0x9d   :  { %2565 = vmatmul.mubr.bf16.gmra.mrb[4].mxu1 %v3363_v46 }
  0x9f   :  { %359 = vmatmul.mubr.bf16.gmra.mrb[8].mxu0 %v3349_v41 }
  0xa0   :  { %368 = vmatprep.mubr.bf16.mxu0 %v4253_v0 }
  0xa7   :  { %369 = vmatmul.mubr.bf16.gmra.mrb[12].mxu0 %v3363_v46 }
 0x162   :  { %v340_v55 = vpop.f32.mrb[0].mxu0 }
 0x163   :  { %v341_v58 = vadd.f32 %v340_v55, %v3370_v53  ;;  %v342_v59 = vpop.f32.mrb[1].mxu0 }
 0x164   :  { %v344_v62 = vpop.f32.mrb[2].mxu0  ;;  %v343_v63 = vadd.f32 %v342_v59, %v3373_v54 }
 0x165   :  { %v345_v1 = vadd.f32 %v344_v62, %v3370_v53  ;;  %v346_v2 = vpop.f32.mrb[3].mxu0  ;;  %v464_v3 = vmul.f32 %v3375_v56, %v341_v58  ;;  %v545_v5 = vmul.f32 %v3377_v57, %v341_v58  ;;  %v3390_v6 = vmul.f32 %v3380_v60, %v341_v58 }
 0x166   :  { %v347_v4 = vadd.f32 %v346_v2, %v3373_v54  ;;  %v3393_v7 = vmul.f32 %v3382_v61, %v341_v58 }
 0x167   :  { %v465_v8 = vmul.f32 %v3375_v56, %v345_v1  ;;  %v546_v9 = vmul.f32 %v3377_v57, %v345_v1  ;;  %v3398_v10 = vmul.f32 %v3380_v60, %v345_v1  ;;  %v3401_v11 = vmul.f32 %v3382_v61, %v345_v1 }
 0x168   :  { %v3403_v12 = vpack.c.bf16 %v347_v4, %v343_v63  ;;  %v3441_v42 = vpop.f32.mrb[0].mxu1 }
 0x169   :  { %v472_v13 = vpack.c.bf16 %v465_v8, %v464_v3  ;;  %v553_v16 = vpack.c.bf16 %v546_v9, %v545_v5  ;;  %v3445_v47 = vpop.f32.mrb[1].mxu1 }
 0x16a   :  { %v350_v20 = vpop.f32.mrb[4].mxu0  ;;  %2568 = vmatprep.subr.bf16.mxu0 %v3403_v12  ;;  %2584 = vmatprep.subr.bf16.mxu1 %v3403_v12  ;;  %v3455_v58 = vpop.f32.mrb[2].mxu1 }
 0x16b   :  { %v351_v21 = vadd.f32 %v350_v20, %v3370_v53  ;;  %v352_v22 = vpop.f32.mrb[5].mxu0  ;;  %2569 = vmatpush3.bf16.xpose.msra.mxu0 %v3403_v12  ;;  %2576 = vmatprep.mubr.bf16.mxu0 %v472_v13  ;;  %v3460_v63 = vpop.f32.mrb[3].mxu1 }
 0x16c   :  { %2585 = vmatpush3.bf16.xpose.msra.mxu1 %v3403_v12  ;;  %2592 = vmatprep.mubr.bf16.mxu1 %v553_v16  ;;  %v354_v23 = vpop.f32.mrb[6].mxu0  ;;  %v353_v25 = vadd.f32 %v352_v22, %v3373_v54 }
 0x16d   :  { %v356_v24 = vpop.f32.mrb[7].mxu0  ;;  %v355_v26 = vadd.f32 %v354_v23, %v3370_v53  ;;  %v3418_v28 = vmul.f32 %v3375_v56, %v351_v21  ;;  %v3421_v29 = vmul.f32 %v3377_v57, %v351_v21  ;;  %v3424_v30 = vmul.f32 %v3380_v60, %v351_v21 }
 0x16e   :  { %v357_v27 = vadd.f32 %v356_v24, %v3373_v54  ;;  %v3427_v31 = vmul.f32 %v3382_v61, %v351_v21 }
 0x16f   :  { %v3430_v32 = vmul.f32 %v3375_v56, %v355_v26  ;;  %v3433_v35 = vmul.f32 %v3377_v57, %v355_v26  ;;  %v3436_v36 = vmul.f32 %v3380_v60, %v355_v26  ;;  %v3439_v37 = vmul.f32 %v3382_v61, %v355_v26 }
 0x170   :  { %v3443_v43 = vpack.c.bf16 %v357_v27, %v353_v25  ;;  %v3483_v25 = vpop.f32.mrb[4].mxu1 }
 0x171   :  { %v473_v48 = vpack.c.bf16 %v3430_v32, %v3418_v28  ;;  %v554_v49 = vpack.c.bf16 %v3433_v35, %v3421_v29  ;;  %v4275_v28 = vpack.c.bf16 %v3401_v11, %v3393_v7 }
 0x172   :  { %v360_v55 = vpop.f32.mrb[8].mxu0  ;;  %2570 = vmatprep.subr.bf16.mxu0 %v3443_v43  ;;  %2586 = vmatprep.subr.bf16.mxu1 %v3443_v43 }
 0x173   :  { %v361_v59 = vadd.f32 %v360_v55, %v3370_v53  ;;  %v362_v62 = vpop.f32.mrb[9].mxu0  ;;  %2571 = vmatpush3.bf16.xpose.msra.mxu0 %v3443_v43 }
 0x174   :  { %2587 = vmatpush3.bf16.xpose.msra.mxu1 %v3443_v43  ;;  %v364_v1 = vpop.f32.mrb[10].mxu0  ;;  %v363_v2 = vadd.f32 %v362_v62, %v3373_v54  ;;  %v3489_v62 = vpop.f32.mrb[5].mxu1 }
 0x175   :  { %v365_v3 = vadd.f32 %v364_v1, %v3370_v53  ;;  %v366_v4 = vpop.f32.mrb[11].mxu0  ;;  %v468_v5 = vmul.f32 %v3375_v56, %v361_v59  ;;  %v549_v9 = vmul.f32 %v3377_v57, %v361_v59  ;;  %v3470_v13 = vmul.f32 %v3380_v60, %v361_v59 }
 0x176   :  { %v367_v8 = vadd.f32 %v366_v4, %v3373_v54  ;;  %v3473_v16 = vmul.f32 %v3382_v61, %v361_v59  ;;  %v3491_v4 = vpop.f32.mrb[6].mxu1 }
 0x177   :  { %v469_v20 = vmul.f32 %v3375_v56, %v365_v3  ;;  %v550_v21 = vmul.f32 %v3377_v57, %v365_v3  ;;  %v3478_v22 = vmul.f32 %v3380_v60, %v365_v3  ;;  %v3481_v23 = vmul.f32 %v3382_v61, %v365_v3 }
 0x178   :  { %v446_v24 = vpack.c.bf16 %v367_v8, %v363_v2  ;;  %v3494_v8 = vpop.f32.mrb[7].mxu1 }
 0x179   :  { %v474_v26 = vpack.c.bf16 %v469_v20, %v468_v5  ;;  %v555_v27 = vpack.c.bf16 %v550_v21, %v549_v9 }
 0x17a   :  { %v370_v1 = vpop.f32.mrb[12].mxu0  ;;  %2572 = vmatprep.subr.bf16.mxu0 %v446_v24  ;;  %2588 = vmatprep.subr.bf16.mxu1 %v446_v24 }
 0x17b   :  { %v371_v3 = vadd.f32 %v370_v1, %v3370_v53  ;;  %v372_v2 = vpop.f32.mrb[13].mxu0  ;;  %2573 = vmatpush3.bf16.xpose.msra.mxu0 %v446_v24 }
 0x17c   :  { %2589 = vmatpush3.bf16.xpose.msra.mxu1 %v446_v24  ;;  %v374_v5 = vpop.f32.mrb[14].mxu0  ;;  %v373_v9 = vadd.f32 %v372_v2, %v3373_v54 }
 0x17d   :  { %v375_v20 = vadd.f32 %v374_v5, %v3370_v53  ;;  %v376_v21 = vpop.f32.mrb[15].mxu0  ;;  %v470_v0 = vmul.f32 %v3375_v56, %v371_v3  ;;  %v551_v55 = vmul.f32 %v3377_v57, %v371_v3  ;;  %v3502_v52 = vmul.f32 %v3380_v60, %v371_v3 }
 0x17e   :  { %v377_v59 = vadd.f32 %v376_v21, %v3373_v54  ;;  %v3505_v1 = vmul.f32 %v3382_v61, %v371_v3 }
 0x17f   :  { %v471_v50 = vmul.f32 %v3375_v56, %v375_v20  ;;  %v552_v19 = vmul.f32 %v3377_v57, %v375_v20  ;;  %v3510_v2 = vmul.f32 %v3380_v60, %v375_v20  ;;  %v3513_v53 = vmul.f32 %v3382_v61, %v375_v20 }
 0x180   :  { %v447_v5 = vpack.c.bf16 %v377_v59, %v373_v9  ;;  %v4276_v9 = vpack.c.bf16 %v3436_v36, %v3424_v30  ;;  %v4277_v20 = vpack.c.bf16 %v3439_v37, %v3427_v31 }
 0x181   :  { %v475_v54 = vpack.c.bf16 %v471_v50, %v470_v0  ;;  %v556_v21 = vpack.c.bf16 %v552_v19, %v551_v55  ;;  %v637_v17 = vpack.c.bf16 %v3510_v2, %v3502_v52  ;;  %v718_v3 = vpack.c.bf16 %v3513_v53, %v3505_v1  ;;  %v162_v0 = vld [vmem:[#allocation7 + $0xc8] sm:$0x1]  ;;  %v3621_v1 = vld [vmem:[#allocation11 + $0x10] sm:$0xff] }
 0x182   :  { %2574 = vmatprep.subr.bf16.mxu0 %v447_v5  ;;  %2590 = vmatprep.subr.bf16.mxu1 %v447_v5  ;;  %v165_v61 = vunpack.c.l.bf16 %v162_v0  ;;  %v4274_v19 = vpack.c.bf16 %v3398_v10, %v3390_v6  ;;  %v3623_v2 = vld [vmem:[#allocation11] sm:$0xff] }
 0x183   :  { %2575 = vmatpush3.bf16.xpose.msra.mxu0 %v447_v5 }
 0x184   :  { %2591 = vmatpush3.bf16.xpose.msra.mxu1 %v447_v5  ;;  %2600 = vmatprep.subr.bf16.mxu0 %v3403_v12 }
 0x185   :  { %2616 = vmatprep.subr.bf16.mxu1 %v3403_v12 }
 0x18a   :  { %2577 = vmatmul.mubr.bf16.vlgmr.msra.gmra.mrb[16].mxu0 %v473_v48 }
 0x18b   :  { %2593 = vmatmul.mubr.bf16.vlgmr.msra.gmra.mrb[8].mxu1 %v554_v49  ;;  %2580 = vmatprep.mubr.bf16.mxu0 %v474_v26 }
 0x18c   :  { %2596 = vmatprep.mubr.bf16.mxu1 %v555_v27  ;;  %2601 = vmatpush3.bf16.xpose.msra.mxu0 %v3403_v12 }
 0x18d   :  { %2617 = vmatpush3.bf16.xpose.msra.mxu1 %v3403_v12  ;;  %2602 = vmatprep.subr.bf16.mxu0 %v3443_v43  ;;  %v177_v12 = vrot.slane %v165_v61, %v3367_v51 }
 0x18e   :  { %2618 = vmatprep.subr.bf16.mxu1 %v3443_v43 }
 0x18f   :  { %v3541_v29 = vadd.f32 %v3445_v47, %v177_v12  ;;  %v3544_v32 = vadd.f32 %v3460_v63, %v177_v12  ;;  %v3555_v35 = vadd.f32 %v3441_v42, %v177_v12  ;;  %v3565_v63 = vadd.f32 %v3489_v62, %v177_v12 }
 0x190   :  { %v3568_v42 = vadd.f32 %v3494_v8, %v177_v12  ;;  %v3575_v26 = vadd.f32 %v3483_v25, %v177_v12  ;;  %v3578_v55 = vadd.f32 %v3491_v4, %v177_v12  ;;  %v4278_v25 = vpack.c.bf16 %v3478_v22, %v3470_v13 }
 0x191   :  { %v1153_v6 = vmul.f32 %v3375_v56, %v3541_v29  ;;  %v1154_v7 = vmul.f32 %v3375_v56, %v3544_v32  ;;  %v1165_v10 = vmul.f32 %v3377_v57, %v3541_v29  ;;  %v1166_v11 = vmul.f32 %v3377_v57, %v3544_v32 }
 0x192   :  { %2581 = vmatmul.mubr.bf16.gmra.mrb[20].mxu0 %v475_v54  ;;  %v1155_v49 = vmul.f32 %v3375_v56, %v3555_v35  ;;  %v1157_v59 = vmul.f32 %v3375_v56, %v3565_v63  ;;  %v1158_v62 = vmul.f32 %v3375_v56, %v3568_v42  ;;  %v4279_v4 = vpack.c.bf16 %v3481_v23, %v3473_v16 }
 0x193   :  { %2597 = vmatmul.mubr.bf16.gmra.mrb[12].mxu1 %v556_v21  ;;  %2608 = vmatprep.mubr.bf16.mxu0 %v4274_v19  ;;  %v1161_v47 = vpack.c.bf16 %v1154_v7, %v1153_v6  ;;  %v1173_v48 = vpack.c.bf16 %v1166_v11, %v1165_v10  ;;  %v1159_v30 = vmul.f32 %v3375_v56, %v3575_v26  ;;  %v3627_v21 = vld [vmem:[#allocation11 + $0x18] sm:$0xff] }
 0x194   :  { %2624 = vmatprep.mubr.bf16.mxu1 %v4275_v28  ;;  %2603 = vmatpush3.bf16.xpose.msra.mxu0 %v3443_v43  ;;  %v1160_v36 = vmul.f32 %v3375_v56, %v3578_v55  ;;  %v1331_v37 = vmul.f32 %v3380_v60, %v3541_v29  ;;  %v1332_v13 = vmul.f32 %v3380_v60, %v3544_v32 }
 0x195   :  { %2619 = vmatpush3.bf16.xpose.msra.mxu1 %v3443_v43  ;;  %2604 = vmatprep.subr.bf16.mxu0 %v446_v24  ;;  %v3558_v43 = vadd.f32 %v3455_v58, %v177_v12  ;;  %v1167_v58 = vmul.f32 %v3377_v57, %v3555_v35  ;;  %v1169_v16 = vmul.f32 %v3377_v57, %v3565_v63 }
 0x196   :  { %2620 = vmatprep.subr.bf16.mxu1 %v446_v24  ;;  %v1164_v31 = vpack.c.bf16 %v1160_v36, %v1159_v30  ;;  %v1170_v60 = vmul.f32 %v3377_v57, %v3568_v42  ;;  %v1172_v52 = vmul.f32 %v3377_v57, %v3578_v55 }
 0x197   :  { %v1156_v50 = vmul.f32 %v3375_v56, %v3558_v43  ;;  %v3610_v56 = vpack.c.bf16 %v1332_v13, %v1331_v37  ;;  %v3679_v13 = vld [vmem:[#allocation11 + $0x28] sm:$0xff] }
 0x198   :  { %v1175_v22 = vpack.c.bf16 %v1170_v60, %v1169_v16  ;;  %v3683_v60 = vld [vmem:[#allocation11 + $0x20] sm:$0xff] }
 0x199   :  { %v1162_v27 = vpack.c.bf16 %v1156_v50, %v1155_v49 }
 0x19c   :  { %2605 = vmatpush3.bf16.xpose.msra.mxu0 %v446_v24 }
 0x19d   :  { %2621 = vmatpush3.bf16.xpose.msra.mxu1 %v446_v24  ;;  %2606 = vmatprep.subr.bf16.mxu0 %v447_v5  ;;  %v1168_v24 = vmul.f32 %v3377_v57, %v3558_v43 }
 0x19e   :  { %2622 = vmatprep.subr.bf16.mxu1 %v447_v5 }
 0x19f   :  { %v1174_v8 = vpack.c.bf16 %v1168_v24, %v1167_v58 }
 0x1a4   :  { %2607 = vmatpush3.bf16.xpose.msra.mxu0 %v447_v5 }
 0x1a5   :  { %2623 = vmatpush3.bf16.xpose.msra.mxu1 %v447_v5  ;;  %2648 = vmatprep.subr.bf16.mxu0 %v1161_v47  ;;  %v1163_v5 = vpack.c.bf16 %v1158_v62, %v1157_v59  ;;  %v3661_v62 = vld [vmem:[#allocation11 + $0x38] sm:$0xff] }
 0x1a6   :  { %2632 = vmatprep.subr.bf16.mxu1 %v1173_v48 }
 0x1ab   :  { %2609 = vmatmul.mubr.bf16.vlgmr.msra.gmra.mrb[24].mxu0 %v4276_v9 }
 0x1ac   :  { %2625 = vmatmul.mubr.bf16.vlgmr.msra.gmra.mrb[16].mxu1 %v4277_v20  ;;  %2612 = vmatprep.mubr.bf16.mxu0 %v4278_v25 }
 0x1ad   :  { %2628 = vmatprep.mubr.bf16.mxu1 %v4279_v4  ;;  %2649 = vmatpush3.bf16.msra.mxu0 %v1161_v47  ;;  %v3645_v47 = vld [vmem:[#allocation11 + $0x8] sm:$0xff] }
 0x1ae   :  { %2633 = vmatpush3.bf16.msra.mxu1 %v1173_v48  ;;  %2650 = vmatprep.subr.bf16.mxu0 %v1162_v27 }
 0x1af   :  { %2634 = vmatprep.subr.bf16.mxu1 %v1174_v8 }
 0x1b1   :  { %2651 = vmatpush3.bf16.msra.mxu0 %v1162_v27 }
 0x1b2   :  { %2635 = vmatpush3.bf16.msra.mxu1 %v1174_v8  ;;  %2652 = vmatprep.subr.bf16.mxu0 %v1163_v5  ;;  %v3663_v8 = vld [vmem:[#allocation11 + $0x30] sm:$0xff] }
 0x1b3   :  { %2613 = vmatmul.mubr.bf16.gmra.mrb[28].mxu0 %v637_v17  ;;  %2636 = vmatprep.subr.bf16.mxu1 %v1175_v22  ;;  %v1171_v17 = vmul.f32 %v3377_v57, %v3575_v26 }
 0x1b4   :  { %2629 = vmatmul.mubr.bf16.gmra.mrb[20].mxu1 %v718_v3 }
 0x1b5   :  { %2653 = vmatpush3.bf16.msra.mxu0 %v1163_v5  ;;  %v1176_v23 = vpack.c.bf16 %v1172_v52, %v1171_v17 }
 0x1b6   :  { %2654 = vmatprep.subr.bf16.mxu0 %v1164_v31  ;;  %2637 = vmatpush3.bf16.msra.mxu1 %v1175_v22 }
 0x1b7   :  { %2638 = vmatprep.subr.bf16.mxu1 %v1176_v23 }
 0x1b9   :  { %2655 = vmatpush3.bf16.msra.mxu0 %v1164_v31 }
 0x1ba   :  { %2664 = vmatprep.subr.bf16.mxu0 %v3610_v56  ;;  %2639 = vmatpush3.bf16.msra.mxu1 %v1176_v23 }
 0x25d   :  { %v2578_v53 = vpop.f32.mrb[16].mxu0 }
 0x25e   :  { %v3625_v54 = vpop.f32.mrb[8].mxu1  ;;  %v3630_v3 = vadd.f32 %v2578_v53, %v3621_v1  ;;  %v510_v0 = vpop.f32.mrb[17].mxu0 }
 0x25f   :  { %v591_v61 = vpop.f32.mrb[9].mxu1  ;;  %v3633_v57 = vadd.f32 %v510_v0, %v3623_v2  ;;  %v2579_v19 = vpop.f32.mrb[18].mxu0 }
 0x260   :  { %v3635_v28 = vpop.f32.mrb[10].mxu1  ;;  %v3638_v12 = vadd.f32 %v2579_v19, %v3627_v21  ;;  %v513_v6 = vpop.f32.mrb[19].mxu0  ;;  %v791_v10 = vsel %vm784_vm0, %v3630_v3, -inf  ;;  %v3643_v11 = vadd.f32 %v591_v61, %v3623_v2 }
 0x261   :  { %v594_v7 = vpop.f32.mrb[11].mxu1  ;;  %792 = vmax.xlane.f32.xlu1 %v791_v10  ;;  %v785_v48 = vsel %vm784_vm0, %v3633_v57, -inf  ;;  %v3655_v58 = vadd.f32 %v513_v6, %v3645_v47 }
 0x262   :  { %786 = vmax.xlane.f32.xlu0 %v785_v48  ;;  %v3650_v49 = vadd.f32 %v594_v7, %v3645_v47  ;;  %v794_v50 = vsel %vm784_vm0, %v3638_v12, -inf  ;;  %v877_v59 = vsel %vm784_vm0, %v3643_v11, -inf }
 0x263   :  { %v788_v16 = vsel %vm784_vm0, %v3655_v58, -inf }
 0x264   :  { %v880_v31 = vsel %vm784_vm0, %v3650_v49, -inf }
 0x265   :  { %795 = vmax.xlane.f32.xlu1 %v794_v50  ;;  %v2582_v27 = vpop.f32.mrb[20].mxu0 }
 0x266   :  { %v3657_v24 = vpop.f32.mrb[12].mxu1  ;;  %v526_v9 = vpop.f32.mrb[21].mxu0  ;;  %878 = vmax.xlane.f32.xlu0 %v877_v59  ;;  %v3677_v37 = vadd.f32 %v2582_v27, %v3663_v8 }
 0x267   :  { %v3665_v20 = vpop.f32.mrb[13].mxu1  ;;  %v2583_v25 = vpop.f32.mrb[22].mxu0  ;;  %v3691_v52 = vadd.f32 %v526_v9, %v3683_v60 }
 0x268   :  { %v3667_v4 = vpop.f32.mrb[14].mxu1  ;;  %v3670_v5 = vadd.f32 %v2583_v25, %v3661_v62  ;;  %v529_v30 = vpop.f32.mrb[23].mxu0  ;;  %v803_v23 = vsel %vm784_vm0, %v3677_v37, -inf }
 0x269   :  { %v3672_v36 = vpop.f32.mrb[15].mxu1  ;;  %881 = vmax.xlane.f32.xlu1 %v880_v31  ;;  %v3686_v22 = vadd.f32 %v529_v30, %v3679_v13  ;;  %v797_v0 = vsel %vm784_vm0, %v3691_v52, -inf }
 0x26a   :  { %789 = vmax.xlane.f32.xlu0 %v788_v16  ;;  %v806_v17 = vsel %vm784_vm0, %v3670_v5, -inf }
 0x26b   :  { %v800_v53 = vsel %vm784_vm0, %v3686_v22, -inf }
 0x26d   :  { %807 = vmax.xlane.f32.xlu1 %v806_v17 }
 0x26e   :  { %804 = vmax.xlane.f32.xlu0 %v803_v23 }
 0x271   :  { %801 = vmax.xlane.f32.xlu1 %v800_v53 }
 0x272   :  { %798 = vmax.xlane.f32.xlu0 %v797_v0 }
 0x27e   :  { %v2610_v61 = vpop.f32.mrb[24].mxu0 }
 0x27f   :  { %v2626_v19 = vpop.f32.mrb[16].mxu1  ;;  %v3700_v6 = vadd.f32 %v2610_v61, %v3621_v1  ;;  %v672_v7 = vpop.f32.mrb[25].mxu0 }
 0x280   :  { %v753_v10 = vpop.f32.mrb[17].mxu1  ;;  %v2611_v48 = vpop.f32.mrb[26].mxu0  ;;  %v3703_v27 = vadd.f32 %v672_v7, %v3623_v2 }
 0x281   :  { %v2627_v50 = vpop.f32.mrb[18].mxu1  ;;  %v3706_v59 = vadd.f32 %v2611_v48, %v3627_v21  ;;  %v675_v9 = vpop.f32.mrb[27].mxu0  ;;  %v975_v30 = vsel %vm784_vm0, %v3700_v6, -inf }
 0x282   :  { %v756_v25 = vpop.f32.mrb[19].mxu1  ;;  %976 = vmax.xlane.f32.xlu0 %v975_v30  ;;  %v3711_v31 = vadd.f32 %v675_v9, %v3645_v47  ;;  %v969_v17 = vsel %vm784_vm0, %v3703_v27, -inf }
 0x283   :  { %v978_v16 = vsel %vm784_vm0, %v3706_v59, -inf }
 0x284   :  { %979 = vmax.xlane.f32.xlu1 %v978_v16  ;;  %v972_v48 = vsel %vm784_vm0, %v3711_v31, -inf }
 0x286   :  { %v2614_v23 = vpop.f32.mrb[28].mxu0  ;;  %970 = vmax.xlane.f32.xlu0 %v969_v17 }
 0x287   :  { %v2630_v53 = vpop.f32.mrb[20].mxu1  ;;  %v3718_v0 = vadd.f32 %v2614_v23, %v3663_v8  ;;  %v688_v61 = vpop.f32.mrb[29].mxu0 }
 0x288   :  { %v769_v7 = vpop.f32.mrb[21].mxu1  ;;  %v2615_v9 = vpop.f32.mrb[30].mxu0  ;;  %973 = vmax.xlane.f32.xlu1 %v972_v48  ;;  %v3723_v51 = vadd.f32 %v688_v61, %v3683_v60  ;;  %v3736_v48 = vadd.f32 %v753_v10, %v3623_v2  ;;  %v3753_v2 = vadd.f32 %v3635_v28, %v3627_v21  ;;  %v3758_v10 = vadd.f32 %v2626_v19, %v3621_v1 }
 0x289   :  { %v2631_v30 = vpop.f32.mrb[22].mxu1  ;;  %v3726_v16 = vadd.f32 %v2615_v9, %v3661_v62  ;;  %v691_v45 = vpop.f32.mrb[31].mxu0  ;;  %v987_v17 = vsel %vm784_vm0, %v3718_v0, -inf  ;;  %v3741_v9 = vadd.f32 %v756_v25, %v3645_v47  ;;  %v3769_v28 = vadd.f32 %v3665_v20, %v3683_v60 }
 0x28a   :  { %v772_v44 = vpop.f32.mrb[23].mxu1  ;;  %988 = vmax.xlane.f32.xlu0 %v987_v17  ;;  %v3731_v23 = vadd.f32 %v691_v45, %v3679_v13  ;;  %v981_v61 = vsel %vm784_vm0, %v3723_v51, -inf  ;;  %v3747_v45 = vadd.f32 %v3625_v54, %v3621_v1  ;;  %v3763_v54 = vadd.f32 %v2627_v50, %v3627_v21 }
 0x28b   :  { %v990_v40 = vsel %vm784_vm0, %v3726_v16, -inf  ;;  %v1064_v47 = vsel %vm784_vm0, %v3741_v9, -inf  ;;  %v3775_v1 = vadd.f32 %v3672_v36, %v3679_v13  ;;  %v3780_v19 = vadd.f32 %v769_v7, %v3683_v60 }
 0x28c   :  { %991 = vmax.xlane.f32.xlu1 %v990_v40  ;;  %v984_v17 = vsel %vm784_vm0, %v3731_v23, -inf  ;;  %v1061_v40 = vsel %vm784_vm0, %v3736_v48, -inf  ;;  %v883_v25 = vsel %vm784_vm0, %v3747_v45, -inf  ;;  %v1070_v21 = vsel %vm784_vm0, %v3763_v54, -inf }
 0x28d   :  { %v889_v50 = vsel %vm784_vm0, %v3769_v28, -inf  ;;  %v3786_v20 = vadd.f32 %v3667_v4, %v3661_v62  ;;  %v3792_v36 = vadd.f32 %v3657_v24, %v3663_v8  ;;  %v1073_v60 = vsel %vm784_vm0, %v3780_v19, -inf }
 0x28e   :  { %982 = vmax.xlane.f32.xlu0 %v981_v61  ;;  %v886_v61 = vsel %vm784_vm0, %v3753_v2, -inf  ;;  %v3797_v7 = vadd.f32 %v772_v44, %v3679_v13  ;;  %v3802_v4 = vadd.f32 %v2630_v53, %v3663_v8  ;;  %v3807_v24 = vadd.f32 %v2631_v30, %v3661_v62 }
 0x290   :  { %985 = vmax.xlane.f32.xlu1 %v984_v17  ;;  %v1067_v17 = vsel %vm784_vm0, %v3758_v10, -inf  ;;  %v1079_v44 = vsel %vm784_vm0, %v3802_v4, -inf  ;;  %v1082_v13 = vsel %vm784_vm0, %v3807_v24, -inf }
 0x292   :  { %1062 = vmax.xlane.f32.xlu0 %v1061_v40  ;;  %v892_v40 = vsel %vm784_vm0, %v3775_v1, -inf }
 0x294   :  { %1065 = vmax.xlane.f32.xlu1 %v1064_v47  ;;  %v898_v47 = vsel %vm784_vm0, %v3786_v20, -inf }
 0x296   :  { %884 = vmax.xlane.f32.xlu0 %v883_v25  ;;  %v895_v25 = vsel %vm784_vm0, %v3792_v36, -inf }
 0x298   :  { %887 = vmax.xlane.f32.xlu1 %v886_v61  ;;  %v1076_v61 = vsel %vm784_vm0, %v3797_v7, -inf }
 0x29a   :  { %1068 = vmax.xlane.f32.xlu0 %v1067_v17 }
 0x29c   :  { %1071 = vmax.xlane.f32.xlu1 %v1070_v21 }
 0x29e   :  { %890 = vmax.xlane.f32.xlu0 %v889_v50 }
 0x2a0   :  { %893 = vmax.xlane.f32.xlu1 %v892_v40 }
 0x2a2   :  { %1074 = vmax.xlane.f32.xlu0 %v1073_v60 }
 0x2a4   :  { %899 = vmax.xlane.f32.xlu1 %v898_v47 }
 0x2a6   :  { %896 = vmax.xlane.f32.xlu0 %v895_v25 }
 0x2a8   :  { %1077 = vmax.xlane.f32.xlu1 %v1076_v61 }
 0x2aa   :  { %1080 = vmax.xlane.f32.xlu0 %v1079_v44 }
 0x2ac   :  { %1083 = vmax.xlane.f32.xlu1 %v1082_v13 }
 0x2ee   :  { %v793_v8 = vpop.xlane.xlu1 %792 }
 0x2ef   :  { %v811_v53 = vsub.f32 %v3630_v3, %v793_v8  ;;  %v787_v17 = vpop.xlane.xlu0 %786 }
 0x2f0   :  { %v809_v21 = vsub.f32 %v3633_v57, %v787_v17 }
 0x2f1   :  { %v821_v62 = vmul.f32 1.442695, %v811_v53 }
 0x2f2   :  { %v817_v30 = vmul.f32 1.442695, %v809_v21  ;;  %v796_v50 = vpop.xlane.xlu1 %795 }
 0x2f3   :  { %2838 = vpow2.f32 %v821_v62  ;;  %v812_v40 = vsub.f32 %v3638_v12, %v796_v50  ;;  %v879_v60 = vpop.xlane.xlu0 %878 }
 0x2f4   :  { %v901_v47 = vsub.f32 %v3643_v11, %v879_v60  ;;  %2840 = vpow2.f32 %v817_v30 }
 0x2f5   :  { %v823_v25 = vmul.f32 1.442695, %v812_v40 }
 0x2f6   :  { %v909_v61 = vmul.f32 1.442695, %v901_v47  ;;  %v882_v44 = vpop.xlane.xlu1 %881 }
 0x2f7   :  { %2842 = vpow2.f32 %v823_v25  ;;  %v902_v13 = vsub.f32 %v3650_v49, %v882_v44  ;;  %v790_v3 = vpop.xlane.xlu0 %789 }
 0x2f8   :  { %v810_v8 = vsub.f32 %v3655_v58, %v790_v3  ;;  %2844 = vpow2.f32 %v909_v61 }
 0x2f9   :  { %v911_v57 = vmul.f32 1.442695, %v902_v13 }
 0x2fa   :  { %v819_v53 = vmul.f32 1.442695, %v810_v8  ;;  %v808_v17 = vpop.xlane.xlu1 %807 }
 0x2fb   :  { %v816_v21 = vsub.f32 %v3670_v5, %v808_v17  ;;  %v805_v12 = vpop.xlane.xlu0 %804 }
 0x2fc   :  { %2846 = vpow2.f32 %v819_v53  ;;  %v815_v11 = vsub.f32 %v3677_v37, %v805_v12 }
 0x2fd   :  { %v3823_v62 = vpop.eup %2838  ;;  %v831_v30 = vmul.f32 1.442695, %v816_v21  ;;  %2848 = vpow2.f32 %v911_v57 }
 0x2fe   :  { %v829_v50 = vmul.f32 1.442695, %v815_v11  ;;  %v802_v40 = vpop.xlane.xlu1 %801  ;;  %v839_v49 = vsel %vm784_vm0, %v3823_v62, 0.0  ;;  %v3827_v58 = vpop.eup %2840 }
 0x2ff   :  { %v814_v60 = vsub.f32 %v3686_v22, %v802_v40  ;;  %840 = vadd.xlane.f32.xlu0 %v839_v49  ;;  %v799_v47 = vpop.xlane.xlu0 %798  ;;  %v833_v13 = vsel %vm784_vm0, %v3827_v58, 0.0 }
 0x300   :  { %2850 = vpow2.f32 %v829_v50  ;;  %v813_v5 = vsub.f32 %v3691_v52, %v799_v47 }
 0x301   :  { %v3831_v25 = vpop.eup %2842  ;;  %2852 = vpow2.f32 %v831_v30  ;;  %v827_v37 = vmul.f32 1.442695, %v814_v60 }
 0x302   :  { %v825_v61 = vmul.f32 1.442695, %v813_v5  ;;  %v842_v44 = vsel %vm784_vm0, %v3831_v25, 0.0  ;;  %v3837_v3 = vpop.eup %2844 }
 0x303   :  { %843 = vadd.xlane.f32.xlu1 %v842_v44  ;;  %834 = vadd.xlane.f32.xlu0 %v833_v13  ;;  %v925_v52 = vsel %vm784_vm0, %v3837_v3, 0.0 }
 0x304   :  { %2854 = vpow2.f32 %v825_v61 }
 0x305   :  { %2856 = vpow2.f32 %v827_v37 }
 0x306   :  { %v3839_v22 = vpop.eup %2846 }
 0x307   :  { %926 = vadd.xlane.f32.xlu0 %v925_v52  ;;  %v836_v8 = vsel %vm784_vm0, %v3839_v22, 0.0  ;;  %v3845_v57 = vpop.eup %2848 }
 0x308   :  { %837 = vadd.xlane.f32.xlu1 %v836_v8  ;;  %v928_v21 = vsel %vm784_vm0, %v3845_v57, 0.0 }
 0x30a   :  { %v3847_v53 = vpop.eup %2850 }
 0x30b   :  { %v3849_v17 = vpop.eup %2852  ;;  %v851_v12 = vsel %vm784_vm0, %v3847_v53, 0.0 }
 0x30c   :  { %929 = vadd.xlane.f32.xlu1 %v928_v21  ;;  %852 = vadd.xlane.f32.xlu0 %v851_v12  ;;  %v854_v50 = vsel %vm784_vm0, %v3849_v17, 0.0 }
 0x30e   :  { %v3855_v11 = vpop.eup %2854 }
 0x30f   :  { %v977_v30 = vpop.xlane.xlu0 %976  ;;  %v845_v40 = vsel %vm784_vm0, %v3855_v11, 0.0  ;;  %v3861_v49 = vpop.eup %2856 }
 0x310   :  { %v995_v60 = vsub.f32 %v3700_v6, %v977_v30  ;;  %855 = vadd.xlane.f32.xlu1 %v854_v50  ;;  %846 = vadd.xlane.f32.xlu0 %v845_v40  ;;  %v848_v44 = vsel %vm784_vm0, %v3861_v49, 0.0 }
 0x311   :  { %v980_v47 = vpop.xlane.xlu1 %979 }
 0x312   :  { %v1005_v5 = vmul.f32 1.442695, %v995_v60  ;;  %v996_v37 = vsub.f32 %v3706_v59, %v980_v47 }
 0x313   :  { %v971_v61 = vpop.xlane.xlu0 %970 }
 0x314   :  { %2858 = vpow2.f32 %v1005_v5  ;;  %v1007_v13 = vmul.f32 1.442695, %v996_v37  ;;  %v993_v52 = vsub.f32 %v3703_v27, %v971_v61  ;;  %849 = vadd.xlane.f32.xlu1 %v848_v44 }
 0x315   :  { %v974_v8 = vpop.xlane.xlu1 %973 }
 0x316   :  { %2860 = vpow2.f32 %v1007_v13  ;;  %v1001_v21 = vmul.f32 1.442695, %v993_v52  ;;  %v994_v6 = vsub.f32 %v3711_v31, %v974_v8 }
 0x317   :  { %v989_v12 = vpop.xlane.xlu0 %988 }
 0x318   :  { %2862 = vpow2.f32 %v1001_v21  ;;  %v1003_v30 = vmul.f32 1.442695, %v994_v6  ;;  %v999_v50 = vsub.f32 %v3718_v0, %v989_v12 }
 0x319   :  { %v992_v59 = vpop.xlane.xlu1 %991 }
 0x31a   :  { %2864 = vpow2.f32 %v1003_v30  ;;  %v1013_v40 = vmul.f32 1.442695, %v999_v50  ;;  %v1000_v60 = vsub.f32 %v3726_v16, %v992_v59 }
 0x31b   :  { %v983_v47 = vpop.xlane.xlu0 %982 }
 0x31c   :  { %2866 = vpow2.f32 %v1013_v40  ;;  %v1015_v5 = vmul.f32 1.442695, %v1000_v60  ;;  %v997_v27 = vsub.f32 %v3723_v51, %v983_v47 }
 0x31d   :  { %v986_v37 = vpop.xlane.xlu1 %985 }
 0x31e   :  { %v3872_v61 = vpop.eup %2858  ;;  %2868 = vpow2.f32 %v1015_v5  ;;  %v1009_v31 = vmul.f32 1.442695, %v997_v27  ;;  %v998_v44 = vsub.f32 %v3731_v23, %v986_v37 }
 0x31f   :  { %v1063_v13 = vpop.xlane.xlu0 %1062  ;;  %v1023_v0 = vsel %vm784_vm0, %v3872_v61, 0.0 }
 0x320   :  { %v3877_v52 = vpop.eup %2860  ;;  %2870 = vpow2.f32 %v1009_v31  ;;  %v1011_v16 = vmul.f32 1.442695, %v998_v44  ;;  %v1085_v8 = vsub.f32 %v3736_v48, %v1063_v13  ;;  %1024 = vadd.xlane.f32.xlu0 %v1023_v0 }
 0x321   :  { %v1066_v21 = vpop.xlane.xlu1 %1065  ;;  %v1026_v51 = vsel %vm784_vm0, %v3877_v52, 0.0 }
 0x322   :  { %v3882_v6 = vpop.eup %2862  ;;  %2872 = vpow2.f32 %v1011_v16  ;;  %v1093_v12 = vmul.f32 1.442695, %v1085_v8  ;;  %v1086_v23 = vsub.f32 %v3741_v9, %v1066_v21  ;;  %1027 = vadd.xlane.f32.xlu1 %v1026_v51 }
 0x323   :  { %v885_v30 = vpop.xlane.xlu0 %884  ;;  %v1017_v50 = vsel %vm784_vm0, %v3882_v6, 0.0 }
 0x324   :  { %v3887_v59 = vpop.eup %2864  ;;  %2874 = vpow2.f32 %v1093_v12  ;;  %v1095_v48 = vmul.f32 1.442695, %v1086_v23  ;;  %v903_v40 = vsub.f32 %v3747_v45, %v885_v30  ;;  %1018 = vadd.xlane.f32.xlu0 %v1017_v50 }
 0x325   :  { %v888_v60 = vpop.xlane.xlu1 %887  ;;  %v1020_v47 = vsel %vm784_vm0, %v3887_v59, 0.0 }
 0x326   :  { %v3892_v5 = vpop.eup %2866  ;;  %2876 = vpow2.f32 %v1095_v48  ;;  %v913_v9 = vmul.f32 1.442695, %v903_v40  ;;  %v904_v27 = vsub.f32 %v3753_v2, %v888_v60  ;;  %1021 = vadd.xlane.f32.xlu1 %v1020_v47 }
 0x327   :  { %v1069_v37 = vpop.xlane.xlu0 %1068  ;;  %v1035_v31 = vsel %vm784_vm0, %v3892_v5, 0.0 }
 0x328   :  { %v3897_v44 = vpop.eup %2868  ;;  %2878 = vpow2.f32 %v913_v9  ;;  %v915_v45 = vmul.f32 1.442695, %v904_v27  ;;  %v1087_v13 = vsub.f32 %v3758_v10, %v1069_v37  ;;  %1036 = vadd.xlane.f32.xlu0 %v1035_v31 }
 0x329   :  { %v1072_v0 = vpop.xlane.xlu1 %1071  ;;  %v1038_v16 = vsel %vm784_vm0, %v3897_v44, 0.0 }
 0x32a   :  { %v3902_v8 = vpop.eup %2870  ;;  %2880 = vpow2.f32 %v915_v45  ;;  %v1097_v2 = vmul.f32 1.442695, %v1087_v13  ;;  %v1088_v21 = vsub.f32 %v3763_v54, %v1072_v0  ;;  %1039 = vadd.xlane.f32.xlu1 %v1038_v16 }
 0x32b   :  { %v891_v51 = vpop.xlane.xlu0 %890  ;;  %v1029_v12 = vsel %vm784_vm0, %v3902_v8, 0.0 }
 0x32c   :  { %v3907_v23 = vpop.eup %2872  ;;  %2882 = vpow2.f32 %v1097_v2  ;;  %v1099_v10 = vmul.f32 1.442695, %v1088_v21  ;;  %v905_v30 = vsub.f32 %v3769_v28, %v891_v51  ;;  %1030 = vadd.xlane.f32.xlu0 %v1029_v12 }
 0x32d   :  { %v894_v50 = vpop.xlane.xlu1 %893  ;;  %v1032_v48 = vsel %vm784_vm0, %v3907_v23, 0.0 }
 0x32e   :  { %v3912_v40 = vpop.eup %2874  ;;  %2884 = vpow2.f32 %v1099_v10  ;;  %v917_v54 = vmul.f32 1.442695, %v905_v30  ;;  %v906_v60 = vsub.f32 %v3775_v1, %v894_v50  ;;  %1033 = vadd.xlane.f32.xlu1 %v1032_v48 }
 0x32f   :  { %v1075_v47 = vpop.xlane.xlu0 %1074  ;;  %v1109_v9 = vsel %vm784_vm0, %v3912_v40, 0.0 }
 0x330   :  { %v3917_v27 = vpop.eup %2876  ;;  %2886 = vpow2.f32 %v917_v54  ;;  %v919_v28 = vmul.f32 1.442695, %v906_v60  ;;  %v1089_v37 = vsub.f32 %v3780_v19, %v1075_v47  ;;  %1110 = vadd.xlane.f32.xlu0 %v1109_v9 }
 0x331   :  { %v900_v31 = vpop.xlane.xlu1 %899  ;;  %v1112_v45 = vsel %vm784_vm0, %v3917_v27, 0.0 }
 0x332   :  { %v3922_v13 = vpop.eup %2878  ;;  %2888 = vpow2.f32 %v919_v28  ;;  %v1101_v1 = vmul.f32 1.442695, %v1089_v37  ;;  %v908_v0 = vsub.f32 %v3786_v20, %v900_v31  ;;  %1113 = vadd.xlane.f32.xlu1 %v1112_v45 }
 0x333   :  { %v897_v16 = vpop.xlane.xlu0 %896  ;;  %v931_v2 = vsel %vm784_vm0, %v3922_v13, 0.0 }
 0x334   :  { %v3927_v21 = vpop.eup %2880  ;;  %2890 = vpow2.f32 %v1101_v1  ;;  %v923_v19 = vmul.f32 1.442695, %v908_v0  ;;  %v907_v51 = vsub.f32 %v3792_v36, %v897_v16  ;;  %932 = vadd.xlane.f32.xlu0 %v931_v2 }
 0x335   :  { %v1078_v12 = vpop.xlane.xlu1 %1077  ;;  %v934_v10 = vsel %vm784_vm0, %v3927_v21, 0.0 }
 0x336   :  { %v3932_v30 = vpop.eup %2882  ;;  %2892 = vpow2.f32 %v923_v19  ;;  %v921_v20 = vmul.f32 1.442695, %v907_v51  ;;  %v1090_v50 = vsub.f32 %v3797_v7, %v1078_v12  ;;  %935 = vadd.xlane.f32.xlu1 %v934_v10 }
 0x337   :  { %v1081_v48 = vpop.xlane.xlu0 %1080  ;;  %v1115_v54 = vsel %vm784_vm0, %v3932_v30, 0.0 }
 0x338   :  { %v3937_v60 = vpop.eup %2884  ;;  %2894 = vpow2.f32 %v921_v20  ;;  %v1103_v36 = vmul.f32 1.442695, %v1090_v50  ;;  %v1091_v47 = vsub.f32 %v3802_v4, %v1081_v48  ;;  %1116 = vadd.xlane.f32.xlu0 %v1115_v54 }
 0x339   :  { %v1084_v9 = vpop.xlane.xlu1 %1083  ;;  %v1118_v28 = vsel %vm784_vm0, %v3937_v60, 0.0 }
 0x33a   :  { %v3942_v37 = vpop.eup %2886  ;;  %2896 = vpow2.f32 %v1103_v36  ;;  %v1105_v7 = vmul.f32 1.442695, %v1091_v47  ;;  %v1092_v31 = vsub.f32 %v3807_v24, %v1084_v9  ;;  %1119 = vadd.xlane.f32.xlu1 %v1118_v28  ;;  %v3975_v47 = vld [vmem:[#allocation10] sm:$0xff]  }
 0x33b   :  { %v937_v45 = vsel %vm784_vm0, %v3942_v37, 0.0  ;;  %2696 = vmatprep.subr.bf16.mxu1 %v3975_v47 }
 0x33c   :  { %v3947_v1 = vpop.eup %2888  ;;  %2898 = vpow2.f32 %v1105_v7  ;;  %v1107_v0 = vmul.f32 1.442695, %v1092_v31  ;;  %938 = vadd.xlane.f32.xlu0 %v937_v45 }
 0x33d   :  { %v940_v4 = vsel %vm784_vm0, %v3947_v1, 0.0 }
 0x33e   :  { %v3951_v16 = vpop.eup %2890  ;;  %2900 = vpow2.f32 %v1107_v0  ;;  %941 = vadd.xlane.f32.xlu1 %v940_v4 }
 0x33f   :  { %v1121_v2 = vsel %vm784_vm0, %v3951_v16, 0.0 }
 0x340   :  { %v3955_v24 = vpop.eup %2892  ;;  %1122 = vadd.xlane.f32.xlu0 %v1121_v2 }
 0x341   :  { %v946_v19 = vsel %vm784_vm0, %v3955_v24, 0.0 }
 0x342   :  { %v3959_v51 = vpop.eup %2894  ;;  %947 = vadd.xlane.f32.xlu1 %v946_v19 }
 0x343   :  { %v943_v12 = vsel %vm784_vm0, %v3959_v51, 0.0 }
 0x344   :  { %v3963_v10 = vpop.eup %2896  ;;  %944 = vadd.xlane.f32.xlu0 %v943_v12 }
 0x345   :  { %v1124_v20 = vsel %vm784_vm0, %v3963_v10, 0.0 }
 0x346   :  { %v3967_v50 = vpop.eup %2898  ;;  %1125 = vadd.xlane.f32.xlu1 %v1124_v20 }
 0x347   :  { %v1127_v48 = vsel %vm784_vm0, %v3967_v50, 0.0 }
 0x348   :  { %v3971_v54 = vpop.eup %2900  ;;  %1128 = vadd.xlane.f32.xlu0 %v1127_v48 }
 0x349   :  { %v1130_v36 = vsel %vm784_vm0, %v3971_v54, 0.0 }
 0x34a   :  { %1131 = vadd.xlane.f32.xlu1 %v1130_v36 }
 0x38c   :  { %v841_v9 = vpop.xlane.xlu0 %840 }
 0x390   :  { %v844_v28 = vpop.xlane.xlu1 %843  ;;  %v835_v7 = vpop.xlane.xlu0 %834 }
 0x391   :  { %2902 = vrcp.f32 %v844_v28 }
 0x392   :  { %2904 = vrcp.f32 %v835_v7 }
 0x393   :  { %2906 = vrcp.f32 %v841_v9 }
 0x394   :  { %v927_v31 = vpop.xlane.xlu0 %926 }
 0x395   :  { %v838_v45 = vpop.xlane.xlu1 %837 }
 0x396   :  { %2908 = vrcp.f32 %v838_v45 }
 0x397   :  { %2910 = vrcp.f32 %v927_v31 }
 0x399   :  { %v930_v0 = vpop.xlane.xlu1 %929  ;;  %v853_v4 = vpop.xlane.xlu0 %852 }
 0x39a   :  { %2912 = vrcp.f32 %v930_v0  ;;  %v2998_v0 = vld [vmem:[#allocation5 + $0x12] ss:$0 sm:$0xff] }
 0x39b   :  { %v2903_v2 = vpop.eup %2902  ;;  %v1333_v15 = vmul.f32 %v2998_v0, %v3555_v35  ;;  %v1334_v14 = vmul.f32 %v2998_v0, %v3558_v43 }
 0x39c   :  { %v2905_v20 = vpop.eup %2904  ;;  %v868_v39 = vmul.f32 %v2903_v2, %v3831_v25 }
 0x39d   :  { %v856_v19 = vpop.xlane.xlu1 %855  ;;  %v847_v12 = vpop.xlane.xlu0 %846  ;;  %v865_v9 = vmul.f32 %v2905_v20, %v3827_v58 }
 0x39e   :  { %v2907_v48 = vpop.eup %2906  ;;  %2914 = vrcp.f32 %v856_v19 }
 0x39f   :  { %2916 = vrcp.f32 %v847_v12  ;;  %v867_v45 = vmul.f32 %v2907_v48, %v3823_v62  ;;  %v1335_v62 = vmul.f32 %v2998_v0, %v3565_v63 }
 0x3a0   :  { %v2909_v36 = vpop.eup %2908  ;;  %2918 = vrcp.f32 %v853_v4  ;;  %v1336_v4 = vmul.f32 %v2998_v0, %v3568_v42 }
 0x3a1   :  { %v850_v28 = vpop.xlane.xlu1 %849  ;;  %v866_v7 = vmul.f32 %v2909_v36, %v3839_v22  ;;  %v2911_v31 = vpop.eup %2910  ;;  %v874_v33 = vpack.c.bf16 %v868_v39, %v867_v45  ;;  %v1340_v22 = vpack.c.bf16 %v1334_v14, %v1333_v15 }
 0x3a2   :  { %2920 = vrcp.f32 %v850_v28  ;;  %v957_v25 = vmul.f32 %v2911_v31, %v3837_v3  ;;  %v1341_v20 = vpack.c.bf16 %v1336_v4, %v1335_v62  ;;  %v1337_v3 = vmul.f32 %v2998_v0, %v3575_v26 }
 0x3a3   :  { %v873_v19 = vpack.c.bf16 %v866_v7, %v865_v9  ;;  %v3998_v9 = vld [vmem:[#allocation5 + $0x13] ss:$0 sm:$0xff] }
 0x3a4   :  { %v2913_v34 = vpop.eup %2912  ;;  %v1428_v7 = vmul.f32 %v3998_v9, %v3541_v29  ;;  %v1429_v31 = vmul.f32 %v3998_v9, %v3544_v32 }
 0x3a5   :  { %2656 = vmatprep.mubr.msk.bf16.mxu0 %vm784_vm0, %v873_v19  ;;  %v958_v58 = vmul.f32 %v2913_v34, %v3845_v57  ;;  %v1338_v34 = vmul.f32 %v2998_v0, %v3578_v55 }
 0x3a6   :  { %2657 = vmatmul.mubr.msk.bf16.vlgmr.msra.gmra.mrb[32].mxu0 %vm784_vm0, %v874_v33 }
 0x3a7   :  { %2665 = vmatpush3.bf16.msra.mxu0 %v3610_v56  ;;  %v965_v2 = vpack.c.bf16 %v958_v58, %v957_v25  ;;  %v1342_v36 = vpack.c.bf16 %v1338_v34, %v1337_v3 }
 0x3a8   :  { %2666 = vmatprep.subr.bf16.mxu0 %v1340_v22  ;;  %v2915_v12 = vpop.eup %2914 }
 0x3a9   :  { %2640 = vmatprep.mubr.msk.bf16.mxu1 %vm784_vm0, %v965_v2  ;;  %v2917_v39 = vpop.eup %2916  ;;  %v872_v15 = vmul.f32 %v2915_v12, %v3849_v17 }
 0x3aa   :  { %v2919_v57 = vpop.eup %2918  ;;  %v869_v56 = vmul.f32 %v2917_v39, %v3855_v11 }
 0x3ab   :  { %2667 = vmatpush3.bf16.msra.mxu0 %v1340_v22  ;;  %v871_v28 = vmul.f32 %v2919_v57, %v3847_v53  ;;  %v1436_v53 = vpack.c.bf16 %v1429_v31, %v1428_v7  ;;  %v1430_v57 = vmul.f32 %v3998_v9, %v3555_v35  ;;  %v1433_v35 = vmul.f32 %v3998_v9, %v3568_v42 }
 0x3ac   :  { %v2921_v14 = vpop.eup %2920  ;;  %2668 = vmatprep.subr.bf16.mxu0 %v1341_v20 }
 0x3ad   :  { %v1025_v33 = vpop.xlane.xlu0 %1024  ;;  %v870_v48 = vmul.f32 %v2921_v14, %v3861_v49  ;;  %v876_v17 = vpack.c.bf16 %v872_v15, %v871_v28  ;;  %v1431_v14 = vmul.f32 %v3998_v9, %v3558_v43 }
 0x3af   :  { %v1028_v45 = vpop.xlane.xlu1 %1027  ;;  %2669 = vmatpush3.bf16.msra.mxu0 %v1341_v20  ;;  %v875_v0 = vpack.c.bf16 %v870_v48, %v869_v56 }
 0x3b0   :  { %2670 = vmatprep.subr.bf16.mxu0 %v1342_v36  ;;  %2922 = vrcp.f32 %v1028_v45 }
 0x3b1   :  { %v1019_v11 = vpop.xlane.xlu0 %1018  ;;  %2660 = vmatprep.mubr.msk.bf16.mxu0 %vm784_vm0, %v875_v0 }
 0x3b2   :  { %2924 = vrcp.f32 %v1019_v11  ;;  %2661 = vmatmul.mubr.msk.bf16.gmra.mrb[36].mxu0 %vm784_vm0, %v876_v17  ;;  %v1434_v17 = vmul.f32 %v3998_v9, %v3575_v26 }
 0x3b3   :  { %2926 = vrcp.f32 %v1025_v33  ;;  %v1022_v49 = vpop.xlane.xlu1 %1021  ;;  %2671 = vmatpush3.bf16.msra.mxu0 %v1342_v36 }
 0x3b4   :  { %2928 = vrcp.f32 %v1022_v49  ;;  %2680 = vmatprep.subr.bf16.mxu0 %v1436_v53 }
 0x3b5   :  { %v1037_v29 = vpop.xlane.xlu0 %1036 }
 0x3b7   :  { %v1040_v32 = vpop.xlane.xlu1 %1039 }
 0x3b8   :  { %2930 = vrcp.f32 %v1040_v32 }
 0x3b9   :  { %v1031_v19 = vpop.xlane.xlu0 %1030 }
 0x3ba   :  { %2932 = vrcp.f32 %v1031_v19  ;;  %v2923_v25 = vpop.eup %2922 }
 0x3bb   :  { %2934 = vrcp.f32 %v1037_v29  ;;  %v1034_v58 = vpop.xlane.xlu1 %1033  ;;  %v1052_v12 = vmul.f32 %v2923_v25, %v3877_v52 }
 0x3bc   :  { %v2925_v22 = vpop.eup %2924  ;;  %2936 = vrcp.f32 %v1034_v58 }
 0x3bd   :  { %v2927_v62 = vpop.eup %2926  ;;  %v1111_v4 = vpop.xlane.xlu0 %1110  ;;  %v1049_v20 = vmul.f32 %v2925_v22, %v3882_v6 }
 0x3be   :  { %v2929_v2 = vpop.eup %2928  ;;  %2938 = vrcp.f32 %v1111_v4  ;;  %v1051_v34 = vmul.f32 %v2927_v62, %v3872_v61  ;;  %v1437_v61 = vpack.c.bf16 %v1431_v14, %v1430_v57  ;;  %v2792_v57 = vld [vmem:[#allocation10 + $0x10] sm:$0xff]  }
 0x3bf   :  { %v1114_v39 = vpop.xlane.xlu1 %1113  ;;  %v1050_v3 = vmul.f32 %v2929_v2, %v3887_v59  ;;  %v1432_v59 = vmul.f32 %v3998_v9, %v3565_v63  ;;  %v2791_v2 = vld [vmem:[#allocation10 + $0x8] sm:$0xff]  }
 0x3c0   :  { %2940 = vrcp.f32 %v1114_v39  ;;  %v1058_v56 = vpack.c.bf16 %v1052_v12, %v1051_v34 }
 0x3c1   :  { %v933_v15 = vpop.xlane.xlu0 %932  ;;  %v1057_v33 = vpack.c.bf16 %v1050_v3, %v1049_v20  ;;  %v1438_v11 = vpack.c.bf16 %v1433_v35, %v1432_v59  ;;  %v2794_v59 = vld [vmem:[#allocation10 + $0x20] sm:$0xff]  }
 0x3c2   :  { %2942 = vrcp.f32 %v933_v15  ;;  %v2931_v52 = vpop.eup %2930 }
 0x3c3   :  { %v936_v48 = vpop.xlane.xlu1 %935  ;;  %2672 = vmatprep.mubr.msk.bf16.mxu0 %vm784_vm0, %v1057_v33  ;;  %v1056_v7 = vmul.f32 %v2931_v52, %v3897_v44 }
 0x3c4   :  { %v2933_v6 = vpop.eup %2932  ;;  %2944 = vrcp.f32 %v936_v48  ;;  %2673 = vmatmul.mubr.msk.bf16.vlgmr.msra.gmra.mrb[32].mxu0 %vm784_vm0, %v1058_v56  ;;  %v2793_v56 = vld [vmem:[#allocation10 + $0x18] sm:$0xff]  }
 0x3c5   :  { %v2935_v43 = vpop.eup %2934  ;;  %2681 = vmatpush3.bf16.msra.mxu0 %v1436_v53  ;;  %v1117_v36 = vpop.xlane.xlu0 %1116  ;;  %v1053_v45 = vmul.f32 %v2933_v6, %v3902_v8  ;;  %v1435_v53 = vmul.f32 %v3998_v9, %v3578_v55 }
 0x3c6   :  { %v2937_v28 = vpop.eup %2936  ;;  %2682 = vmatprep.subr.bf16.mxu0 %v1437_v61  ;;  %2946 = vrcp.f32 %v1117_v36  ;;  %v1055_v42 = vmul.f32 %v2935_v43, %v3892_v5 }
 0x3c7   :  { %v1120_v31 = vpop.xlane.xlu1 %1119  ;;  %v1054_v0 = vmul.f32 %v2937_v28, %v3907_v23  ;;  %v1439_v5 = vpack.c.bf16 %v1435_v53, %v1434_v17 }
 0x3c8   :  { %v2939_v63 = vpop.eup %2938  ;;  %2948 = vrcp.f32 %v1120_v31  ;;  %v1060_v8 = vpack.c.bf16 %v1056_v7, %v1055_v42 }
 0x3c9   :  { %2683 = vmatpush3.bf16.msra.mxu0 %v1437_v61  ;;  %v939_v49 = vpop.xlane.xlu0 %938  ;;  %v1059_v29 = vpack.c.bf16 %v1054_v0, %v1053_v45  ;;  %v1141_v26 = vmul.f32 %v2939_v63, %v3912_v40  ;;  %v2797_v45 = vld [vmem:[#allocation10 + $0x38] sm:$0xff]  }
 0x3ca   :  { %v2941_v44 = vpop.eup %2940  ;;  %2684 = vmatprep.subr.bf16.mxu0 %v1438_v11  ;;  %2950 = vrcp.f32 %v939_v49  ;;  %v2800_v0 = vld [vmem:[#allocation8 + $0x4] ss:$8 sps:$4 sm:$0xff]  }
 0x3cb   :  { %v942_v32 = vpop.xlane.xlu1 %941  ;;  %2676 = vmatprep.mubr.msk.bf16.mxu0 %vm784_vm0, %v1059_v29  ;;  %v1142_v23 = vmul.f32 %v2941_v44, %v3917_v27 }
 0x3cc   :  { %v2943_v19 = vpop.eup %2942  ;;  %2952 = vrcp.f32 %v942_v32  ;;  %2677 = vmatmul.mubr.msk.bf16.gmra.mrb[36].mxu0 %vm784_vm0, %v1060_v8 }
 0x3cd   :  { %2685 = vmatpush3.bf16.msra.mxu0 %v1438_v11  ;;  %v1123_v55 = vpop.xlane.xlu0 %1122  ;;  %v1149_v9 = vpack.c.bf16 %v1142_v23, %v1141_v26  ;;  %v959_v58 = vmul.f32 %v2943_v19, %v3922_v13  ;;  %v2798_v19 = vld [vmem:[#allocation8] ss:$8 sps:$4 sm:$0xff]  }
 0x3ce   :  { %v2945_v25 = vpop.eup %2944  ;;  %2686 = vmatprep.subr.bf16.mxu0 %v1439_v5 }
 0x3cf   :  { %v960_v22 = vmul.f32 %v2945_v25, %v3927_v21  ;;  %v948_v62 = vpop.xlane.xlu1 %947  ;;  %2688 = vmatprep.mubr.msk.bf16.mxu0 %vm784_vm0, %v1149_v9  ;;  %v2801_v9 = vld [vmem:[#allocation8 + $0x10] ss:$8 sps:$4 sm:$0xff]  }
 0x3d0   :  { %v2947_v40 = vpop.eup %2946  ;;  %2954 = vrcp.f32 %v948_v62 }
 0x3d1   :  { %v966_v27 = vpack.c.bf16 %v960_v22, %v959_v58  ;;  %2956 = vrcp.f32 %v1123_v55  ;;  %2687 = vmatpush3.bf16.msra.mxu0 %v1439_v5  ;;  %v945_v4 = vpop.xlane.xlu0 %944  ;;  %v1143_v39 = vmul.f32 %v2947_v40, %v3932_v30  ;;  %v2803_v5 = vld [vmem:[#allocation8 + $0x14] ss:$8 sps:$4 sm:$0xff]   ;;  %v2806_v58 = vld [vmem:[#allocation8 + $0x24] ss:$8 sps:$4 sm:$0xff]   ;;  %v2804_v40 = vld [vmem:[#allocation8 + $0x20] ss:$8 sps:$4 sm:$0xff]  }
 0x3d2   :  { %v2949_v12 = vpop.eup %2948  ;;  %2958 = vrcp.f32 %v945_v4 }
 0x3d3   :  { %v1144_v20 = vmul.f32 %v2949_v12, %v3937_v60  ;;  %v1126_v3 = vpop.xlane.xlu1 %1125  ;;  %2641 = vmatmul.mubr.msk.bf16.vlgmr.msra.gmra.mrb[24].mxu1 %vm784_vm0, %v966_v27  ;;  %v2809_v27 = vld [vmem:[#allocation8 + $0x34] ss:$8 sps:$4 sm:$0xff]  }
 0x3d4   :  { %v2951_v13 = vpop.eup %2950  ;;  %2960 = vrcp.f32 %v1126_v3  ;;  %2697 = vmatpush3.bf16.msra.mxu1 %v3975_v47  ;;  %v2807_v3 = vld [vmem:[#allocation8 + $0x30] ss:$8 sps:$4 sm:$0xff]  }
 0x3d5   :  { %v1150_v21 = vpack.c.bf16 %v1144_v20, %v1143_v39  ;;  %v1129_v34 = vpop.xlane.xlu0 %1128  ;;  %2698 = vmatprep.subr.bf16.mxu1 %v2791_v2  ;;  %v961_v30 = vmul.f32 %v2951_v13, %v3942_v37 }
 0x3d6   :  { %v2953_v14 = vpop.eup %2952  ;;  %2962 = vrcp.f32 %v1129_v34  ;;  %v2812_v34 = vld [vmem:[#allocation8 + $0x44] ss:$8 sps:$4 sm:$0xff]  }
 0x3d7   :  { %v1132_v15 = vpop.xlane.xlu1 %1131  ;;  %2689 = vmatmul.mubr.msk.bf16.vlgmr.msra.gmra.mrb[32].mxu0 %vm784_vm0, %v1150_v21  ;;  %v962_v60 = vmul.f32 %v2953_v14, %v3947_v1 }
 0x3d8   :  { %2964 = vrcp.f32 %v1132_v15  ;;  %2699 = vmatpush3.bf16.msra.mxu1 %v2791_v2 }
 0x3d9   :  { %v967_v33 = vpack.c.bf16 %v962_v60, %v961_v30  ;;  %2700 = vmatprep.subr.bf16.mxu1 %v2792_v57  ;;  %v2810_v30 = vld [vmem:[#allocation8 + $0x40] ss:$8 sps:$4 sm:$0xff]   ;;  %v2815_v60 = vld [vmem:[#allocation8 + $0x54] ss:$8 sps:$4 sm:$0xff]  }
 0x3da   :  { %v2955_v52 = vpop.eup %2954 }
 0x3db   :  { %v2957_v47 = vpop.eup %2956  ;;  %2644 = vmatprep.mubr.msk.bf16.mxu1 %vm784_vm0, %v967_v33  ;;  %v964_v61 = vmul.f32 %v2955_v52, %v3955_v24  ;;  %v2813_v33 = vld [vmem:[#allocation8 + $0x50] ss:$8 sps:$4 sm:$0xff]   ;;  %v2818_v52 = vld [vmem:[#allocation8 + $0x64] ss:$8 sps:$4 sm:$0xff]  }
 0x3dc   :  { %v2959_v48 = vpop.eup %2958  ;;  %2701 = vmatpush3.bf16.msra.mxu1 %v2792_v57  ;;  %v1145_v1 = vmul.f32 %v2957_v47, %v3951_v16  ;;  %v2795_v16 = vld [vmem:[#allocation10 + $0x28] sm:$0xff]   ;;  %v2816_v47 = vld [vmem:[#allocation8 + $0x60] ss:$8 sps:$4 sm:$0xff]  }
 0x3dd   :  { %v963_v6 = vmul.f32 %v2959_v48, %v3959_v51  ;;  %2702 = vmatprep.subr.bf16.mxu1 %v2793_v56  ;;  %v2821_v48 = vld [vmem:[#allocation8 + $0x74] ss:$8 sps:$4 sm:$0xff]  }
 0x3de   :  { %v2961_v37 = vpop.eup %2960 }
 0x3df   :  { %v968_v35 = vpack.c.bf16 %v964_v61, %v963_v6  ;;  %v1146_v43 = vmul.f32 %v2961_v37, %v3963_v10  ;;  %v2796_v10 = vld [vmem:[#allocation10 + $0x30] sm:$0xff]   ;;  %v2819_v6 = vld [vmem:[#allocation8 + $0x70] ss:$8 sps:$4 sm:$0xff]  }
 0x3e0   :  { %v2963_v36 = vpop.eup %2962  ;;  %2703 = vmatpush3.bf16.msra.mxu1 %v2793_v56  ;;  %v4280_v56 = vmov 0   ;;  %v2822_v61 = vld [vmem:[#allocation10 + $0x80] sm:$0xff]   ;;  %v2824_v37 = vld [vmem:[#allocation10 + $0x88] sm:$0xff]  }
 0x3e1   :  { %2645 = vmatmul.mubr.msk.bf16.gmra.mrb[28].mxu1 %vm784_vm0, %v968_v35  ;;  %v1151_v28 = vpack.c.bf16 %v1146_v43, %v1145_v1  ;;  %2704 = vmatprep.subr.bf16.mxu1 %v2794_v59  ;;  %v1147_v51 = vmul.f32 %v2963_v36, %v3967_v50  ;;  %v2825_v35 = vld [vmem:[#allocation10 + $0x48] sm:$0xff]   ;;  %v2827_v1 = vld [vmem:[#allocation10 + $0x50] sm:$0xff]   ;;  %v2829_v43 = vld [vmem:[#allocation10 + $0x58] sm:$0xff]  }
 0x3e2   :  { %v2965_v7 = vpop.eup %2964  ;;  %2504 = vmatprep.subr.bf16.mxu0 %v2822_v61  ;;  %v2831_v36 = vld [vmem:[#allocation10 + $0x60] sm:$0xff]  }
 0x3e3   :  { %2692 = vmatprep.mubr.msk.bf16.mxu0 %vm784_vm0, %v1151_v28  ;;  %v1148_v24 = vmul.f32 %v2965_v7, %v3971_v54  ;;  %v2833_v28 = vld [vmem:[#allocation10 + $0x68] sm:$0xff]   ;;  %v2834_v7 = vld [vmem:[#allocation10 + $0xb0] sm:$0xff]  }
 0x3e4   :  { %2705 = vmatpush3.bf16.msra.mxu1 %v2794_v59  ;;  %v2823_v59 = vld [vmem:[#allocation10 + $0x40] sm:$0xff]  }
 0x3e5   :  { %v1152_v31 = vpack.c.bf16 %v1148_v24, %v1147_v51  ;;  %2706 = vmatprep.subr.bf16.mxu1 %v2795_v16  ;;  %2505 = vmatpush3.bf16.msra.mxu0 %v2823_v59  ;;  %v2835_v51 = vld [vmem:[#allocation10 + $0x70] sm:$0xff]   ;;  %v2836_v24 = vld [vmem:[#allocation10 + $0xb8] sm:$0xff]  }
 0x3e6   :  { %2506 = vmatprep.subr.bf16.mxu0 %v2824_v37 }
 0x3e7   :  { %2693 = vmatmul.mubr.msk.bf16.gmra.mrb[36].mxu0 %vm784_vm0, %v1152_v31  ;;  %v2837_v31 = vld [vmem:[#allocation10 + $0x78] sm:$0xff]  }
 0x3e8   :  { %2707 = vmatpush3.bf16.msra.mxu1 %v2795_v16  ;;  %v2372_v16 = vld [vmem:[#allocation5 + $0x14] ss:$0 sm:$0xff] }
 0x3e9   :  { %2708 = vmatprep.subr.bf16.mxu1 %v2796_v10  ;;  %2507 = vmatpush3.bf16.msra.mxu0 %v2825_v35 }
 0x3ec   :  { %2709 = vmatpush3.bf16.msra.mxu1 %v2796_v10 }
 0x3ed   :  { %2710 = vmatprep.subr.bf16.mxu1 %v2797_v45 }
 0x3f0   :  { %2711 = vmatpush3.bf16.msra.mxu1 %v2797_v45 }
 0x3f1   :  { %1893 = vmatprep.subr.bf16.mxu1 %v2800_v0 }
 0x4a6   :  { %v2642_v17 = vpop.f32.mrb[24].mxu1 }
 0x4a7   :  { %v1223_v63 = vpop.f32.mrb[25].mxu1 }
 0x4a8   :  { %v2643_v50 = vpop.f32.mrb[26].mxu1 }
 0x4a9   :  { %v1226_v11 = vpop.f32.mrb[27].mxu1 }
 0x4aa   :  { %v2690_v54 = vpop.f32.mrb[32].mxu0 }
 0x4ab   :  { %v2720_v42 = vadd.f32 %v2690_v54, %v2642_v17  ;;  %v1486_v53 = vpop.f32.mrb[33].mxu0  ;;  %v4281_v54 = vld [vmem:[#allocation21_spill] sm:$0xff] }
 0x4ac   :  { %v2721_v49 = vadd.f32 %v1486_v53, %v1223_v63  ;;  %v2691_v29 = vpop.f32.mrb[34].mxu0 }
 0x4ad   :  { %v2722_v44 = vadd.f32 %v2691_v29, %v2643_v50  ;;  %v1489_v8 = vpop.f32.mrb[35].mxu0 }
 0x4ae   :  { %v2723_v32 = vadd.f32 %v1489_v8, %v1226_v11 }
 0x4af   :  { %v1526_v26 = vpack.c.bf16 %v2722_v44, %v2720_v42  ;;  %v4283_v44 = vld [vmem:[#allocation19_spill] sm:$0xff] }
 0x4b0   :  { %v1525_v23 = vpack.c.bf16 %v2723_v32, %v2721_v49  ;;  %v4282_v49 = vld [vmem:[#allocation22_spill] sm:$0xff]  ;;  %v4284_v32 = vld [vmem:[#allocation20_spill] sm:$0xff] }
 0x4b2   :  { %2712 = vmatprep.mubr.bf16.mxu1 %v1525_v23 }
 0x4b3   :  { %2713 = vmatmul.mubr.bf16.vlgmr.msra.gmra.mrb[32].mxu1 %v1526_v26 }
 0x4b4   :  { %v2646_v55 = vpop.f32.mrb[28].mxu1  ;;  %1894 = vmatpush1.bf16.msra.mxu1 %v2798_v19 }
 0x4b5   :  { %v1239_v25 = vpop.f32.mrb[29].mxu1  ;;  %1895 = vmatprep.subr.bf16.mxu1 %v2803_v5 }
 0x4b6   :  { %v2647_v22 = vpop.f32.mrb[30].mxu1 }
 0x4b7   :  { %v1242_v62 = vpop.f32.mrb[31].mxu1 }
 0x4b8   :  { %1896 = vmatpush1.bf16.msra.mxu1 %v2801_v9 }
 0x4b9   :  { %1897 = vmatprep.subr.bf16.mxu1 %v2806_v58 }
 0x4ba   :  { %v2694_v4 = vpop.f32.mrb[36].mxu0 }
 0x4bb   :  { %v2724_v2 = vadd.f32 %v2694_v4, %v2646_v55  ;;  %v1502_v12 = vpop.f32.mrb[37].mxu0 }
 0x4bc   :  { %v2725_v39 = vadd.f32 %v1502_v12, %v1239_v25  ;;  %v2695_v20 = vpop.f32.mrb[38].mxu0  ;;  %1898 = vmatpush1.bf16.msra.mxu1 %v2804_v40  ;;  %v4287_v12 = vld [vmem:[#allocation25_spill] sm:$0xff] }
 0x4bd   :  { %v2726_v13 = vadd.f32 %v2695_v20, %v2647_v22  ;;  %v1505_v21 = vpop.f32.mrb[39].mxu0  ;;  %1899 = vmatprep.subr.bf16.mxu1 %v2809_v27  ;;  %v4285_v22 = vld [vmem:[#allocation23_spill] sm:$0xff]  ;;  %v4286_v27 = vld [vmem:[#allocation24_spill] sm:$0xff] }
 0x4be   :  { %v2727_v57 = vadd.f32 %v1505_v21, %v1242_v62 }
 0x4bf   :  { %v1528_v14 = vpack.c.bf16 %v2726_v13, %v2724_v2  ;;  %v1802_v2 = vld [vmem:[#allocation8 + $0x80] sm:$0x11] }
 0x4c0   :  { %v1527_v15 = vpack.c.bf16 %v2727_v57, %v2725_v39  ;;  %1900 = vmatpush1.bf16.msra.mxu1 %v2807_v3  ;;  %v1803_v20 = vunpack.c.l.bf16 %v1802_v2  ;;  %v4288_v3 = vld [vmem:[#allocation26_spill] sm:$0xff]  ;;  %v1804_v21 = vunpack.c.h.bf16 %v1802_v2 }
 0x4c1   :  { %1901 = vmatprep.subr.bf16.mxu1 %v2812_v34  ;;  %v4289_v34 = vld [vmem:[#allocation27_spill] sm:$0xff] }
 0x4c2   :  { %2716 = vmatprep.mubr.bf16.mxu1 %v1527_v15  ;;  %v1808_v57 = vrot.slane %v1803_v20, %v4289_v34 }
 0x4c3   :  { %2717 = vmatmul.mubr.bf16.gmra.mrb[36].mxu1 %v1528_v14  ;;  %v1812_v14 = vrot.slane %v1804_v21, %v4289_v34 }
 0x4c4   :  { %1902 = vmatpush1.bf16.msra.mxu1 %v2810_v30  ;;  %1925 = vmatprep.mubr.bf16.mxu1 %v4280_v56 }
 0x4c5   :  { %1903 = vmatprep.subr.bf16.mxu1 %v2815_v60 }
 0x4c8   :  { %1904 = vmatpush1.bf16.msra.mxu1 %v2813_v33 }
 0x4c9   :  { %1905 = vmatprep.subr.bf16.mxu1 %v2818_v52 }
 0x4cc   :  { %1906 = vmatpush1.bf16.msra.mxu1 %v2816_v47 }
 0x4cd   :  { %1907 = vmatprep.subr.bf16.mxu1 %v2821_v48 }
 0x4d0   :  { %1908 = vmatpush1.bf16.msra.mxu1 %v2819_v6 }
 0x4d3   :  { %1926 = vmatmul.mubr.bf16.vlgmr.msra.gmra.mrb[40].mxu1 %v3324_v18  ;;  %v2826_v18 = vld [vmem:[#allocation10 + $0x90] sm:$0xff]  }
 0x4d4   :  { %1935 = vmatprep.mubr.bf16.mxu1 %v4280_v56  ;;  %2508 = vmatprep.subr.bf16.mxu0 %v2826_v18 }
 0x4d5   :  { %2509 = vmatpush3.bf16.msra.mxu0 %v2827_v1 }
 0x4db   :  { %1936 = vmatmul.mubr.bf16.gmra.mrb[44].mxu1 %v3337_v38  ;;  %v2828_v38 = vld [vmem:[#allocation10 + $0x98] sm:$0xff]  }
 0x4dc   :  { %1945 = vmatprep.mubr.bf16.mxu1 %v4280_v56  ;;  %2510 = vmatprep.subr.bf16.mxu0 %v2828_v38 }
 0x4dd   :  { %2511 = vmatpush3.bf16.msra.mxu0 %v2829_v43 }
 0x4e3   :  { %1946 = vmatmul.mubr.bf16.gmra.mrb[48].mxu1 %v3349_v41  ;;  %v2830_v41 = vld [vmem:[#allocation10 + $0xa0] sm:$0xff]  }
 0x4e4   :  { %1955 = vmatprep.mubr.bf16.mxu1 %v4280_v56  ;;  %2512 = vmatprep.subr.bf16.mxu0 %v2830_v41 }
 0x4e5   :  { %2513 = vmatpush3.bf16.msra.mxu0 %v2831_v36 }
 0x4eb   :  { %1956 = vmatmul.mubr.bf16.gmra.mrb[52].mxu1 %v3363_v46  ;;  %v2832_v46 = vld [vmem:[#allocation10 + $0xa8] sm:$0xff]  }
 0x4ec   :  { %2514 = vmatprep.subr.bf16.mxu0 %v2832_v46 }
 0x4ed   :  { %2515 = vmatpush3.bf16.msra.mxu0 %v2833_v28 }
 0x4ee   :  { %2516 = vmatprep.subr.bf16.mxu0 %v2834_v7 }
 0x4f1   :  { %2517 = vmatpush3.bf16.msra.mxu0 %v2835_v51 }
 0x4f2   :  { %2518 = vmatprep.subr.bf16.mxu0 %v2836_v24 }
 0x4f5   :  { %2519 = vmatpush3.bf16.msra.mxu0 %v2837_v31 }
 0x586   :  { %v2714_v10 = vpop.f32.mrb[32].mxu1 }
 0x587   :  { %v1641_v45 = vadd.f32 %v2714_v10, %v2372_v16  ;;  %v1632_v0 = vpop.f32.mrb[33].mxu1 }
 0x588   :  { %v2715_v17 = vpop.f32.mrb[34].mxu1  ;;  %v1633_v63 = vadd.f32 %v2372_v16, %v1632_v0 }
 0x589   :  { %v1644_v50 = vadd.f32 %v2715_v17, %v2372_v16  ;;  %v1635_v11 = vpop.f32.mrb[35].mxu1  ;;  %v4061_v42 = vadd.f32 %v1641_v45, %v4281_v54 }
 0x58a   :  { %v1636_v53 = vadd.f32 %v2372_v16, %v1635_v11  ;;  %v4069_v8 = vadd.f32 %v1633_v63, %v4283_v44 }
 0x58b   :  { %1677 = vadd.xlane.f32.xlu0 %v4061_v42  ;;  %v4065_v29 = vadd.f32 %v1644_v50, %v4282_v49 }
 0x58c   :  { %v4073_v26 = vadd.f32 %v1636_v53, %v4284_v32 }
 0x58d   :  { %1679 = vadd.xlane.f32.xlu1 %v4065_v29 }
 0x58f   :  { %1673 = vadd.xlane.f32.xlu0 %v4069_v8 }
 0x591   :  { %1675 = vadd.xlane.f32.xlu1 %v4073_v26 }
 0x596   :  { %v2718_v23 = vpop.f32.mrb[36].mxu1 }
 0x597   :  { %v1648_v19 = vpop.f32.mrb[37].mxu1  ;;  %v1657_v25 = vadd.f32 %v2718_v23, %v2372_v16 }
 0x598   :  { %v1649_v5 = vadd.f32 %v2372_v16, %v1648_v19  ;;  %v2719_v55 = vpop.f32.mrb[38].mxu1 }
 0x599   :  { %v1651_v9 = vpop.f32.mrb[39].mxu1  ;;  %v1660_v40 = vadd.f32 %v2719_v55, %v2372_v16  ;;  %v4085_v39 = vadd.f32 %v1657_v25, %v4287_v12 }
 0x59a   :  { %v1652_v58 = vadd.f32 %v2372_v16, %v1651_v9  ;;  %v4077_v62 = vadd.f32 %v1649_v5, %v4285_v22 }
 0x59b   :  { %v4089_v13 = vadd.f32 %v1660_v40, %v4288_v3 }
 0x59c   :  { %1681 = vadd.xlane.f32.xlu0 %v4077_v62  ;;  %v4081_v4 = vadd.f32 %v1652_v58, %v4286_v27 }
 0x59e   :  { %1683 = vadd.xlane.f32.xlu1 %v4081_v4 }
 0x5a0   :  { %1685 = vadd.xlane.f32.xlu0 %v4085_v39 }
 0x5a2   :  { %1687 = vadd.xlane.f32.xlu1 %v4089_v13 }
 0x5a6   :  { %v1927_v15 = vpop.f32.mrb[40].mxu1 }
 0x5a7   :  { %v1928_v30 = vadd.f32 %v1927_v15, %v1808_v57  ;;  %v1929_v60 = vpop.f32.mrb[41].mxu1 }
 0x5a8   :  { %v1930_v33 = vadd.f32 %v1929_v60, %v1812_v14  ;;  %v1931_v56 = vpop.f32.mrb[42].mxu1 }
 0x5a9   :  { %v1966_v52 = vmax.f32 %v1928_v30, 0.0  ;;  %v1932_v47 = vadd.f32 %v1931_v56, %v1808_v57  ;;  %v1933_v48 = vpop.f32.mrb[43].mxu1 }
 0x5aa   :  { %v1967_v6 = vmax.f32 %v1930_v33, 0.0  ;;  %v1934_v61 = vadd.f32 %v1933_v48, %v1812_v14 }
 0x5ab   :  { %v1968_v59 = vmax.f32 %v1932_v47, 0.0 }
 0x5ac   :  { %v1969_v37 = vmax.f32 %v1934_v61, 0.0 }
 0x5ad   :  { %v1982_v35 = vpack.c.bf16 %v1968_v59, %v1966_v52 }
 0x5ae   :  { %v1983_v18 = vpack.c.bf16 %v1969_v37, %v1967_v6  ;;  %v1937_v1 = vpop.f32.mrb[44].mxu1 }
 0x5af   :  { %v1938_v38 = vadd.f32 %v1937_v1, %v1808_v57  ;;  %v1939_v43 = vpop.f32.mrb[45].mxu1 }
 0x5b0   :  { %v1940_v41 = vadd.f32 %v1939_v43, %v1812_v14  ;;  %v1941_v36 = vpop.f32.mrb[46].mxu1  ;;  %2155 = vmatprep.mubr.bf16.mxu0 %v1983_v18 }
 0x5b1   :  { %v1970_v46 = vmax.f32 %v1938_v38, 0.0  ;;  %v1942_v28 = vadd.f32 %v1941_v36, %v1808_v57  ;;  %v1943_v7 = vpop.f32.mrb[47].mxu1  ;;  %2156 = vmatmul.mubr.bf16.vlgmr.msra.gmra.mrb[40].mxu0 %v1982_v35 }
 0x5b2   :  { %v1971_v51 = vmax.f32 %v1940_v41, 0.0  ;;  %v1944_v24 = vadd.f32 %v1943_v7, %v1812_v14 }
 0x5b3   :  { %v1972_v31 = vmax.f32 %v1942_v28, 0.0 }
 0x5b4   :  { %v1973_v16 = vmax.f32 %v1944_v24, 0.0 }
 0x5b5   :  { %v1984_v10 = vpack.c.bf16 %v1972_v31, %v1970_v46 }
 0x5b6   :  { %v1985_v45 = vpack.c.bf16 %v1973_v16, %v1971_v51  ;;  %v1947_v0 = vpop.f32.mrb[48].mxu1 }
 0x5b7   :  { %v1948_v17 = vadd.f32 %v1947_v0, %v1808_v57  ;;  %v1949_v63 = vpop.f32.mrb[49].mxu1 }
 0x5b8   :  { %v1950_v50 = vadd.f32 %v1949_v63, %v1812_v14  ;;  %v1951_v11 = vpop.f32.mrb[50].mxu1  ;;  %2163 = vmatprep.mubr.bf16.mxu0 %v1985_v45 }
 0x5b9   :  { %v1974_v54 = vmax.f32 %v1948_v17, 0.0  ;;  %v1952_v53 = vadd.f32 %v1951_v11, %v1808_v57  ;;  %v1953_v49 = vpop.f32.mrb[51].mxu1  ;;  %2164 = vmatmul.mubr.bf16.gmra.mrb[44].mxu0 %v1984_v10 }
 0x5ba   :  { %v1975_v44 = vmax.f32 %v1950_v50, 0.0  ;;  %v1954_v32 = vadd.f32 %v1953_v49, %v1812_v14 }
 0x5bb   :  { %v1976_v23 = vmax.f32 %v1952_v53, 0.0 }
 0x5bc   :  { %v1977_v19 = vmax.f32 %v1954_v32, 0.0 }
 0x5bd   :  { %v1986_v5 = vpack.c.bf16 %v1976_v23, %v1974_v54 }
 0x5be   :  { %v1987_v55 = vpack.c.bf16 %v1977_v19, %v1975_v44  ;;  %v1957_v9 = vpop.f32.mrb[52].mxu1 }
 0x5bf   :  { %v1958_v25 = vadd.f32 %v1957_v9, %v1808_v57  ;;  %v1959_v58 = vpop.f32.mrb[53].mxu1 }
 0x5c0   :  { %v1960_v22 = vadd.f32 %v1959_v58, %v1812_v14  ;;  %v1961_v40 = vpop.f32.mrb[54].mxu1  ;;  %2171 = vmatprep.mubr.bf16.mxu0 %v1987_v55 }
 0x5c1   :  { %v1978_v27 = vmax.f32 %v1958_v25, 0.0  ;;  %v1962_v2 = vadd.f32 %v1961_v40, %v1808_v57  ;;  %v1963_v12 = vpop.f32.mrb[55].mxu1  ;;  %2172 = vmatmul.mubr.bf16.gmra.mrb[48].mxu0 %v1986_v5 }
 0x5c2   :  { %v1979_v20 = vmax.f32 %v1960_v22, 0.0  ;;  %v1964_v3 = vadd.f32 %v1963_v12, %v1812_v14 }
 0x5c3   :  { %v1980_v21 = vmax.f32 %v1962_v2, 0.0 }
 0x5c4   :  { %v1981_v34 = vmax.f32 %v1964_v3, 0.0 }
 0x5c5   :  { %v1988_v15 = vpack.c.bf16 %v1980_v21, %v1978_v27 }
 0x5c6   :  { %v1989_v30 = vpack.c.bf16 %v1981_v34, %v1979_v20 }
 0x5c8   :  { %2179 = vmatprep.mubr.bf16.mxu0 %v1989_v30 }
 0x5c9   :  { %2180 = vmatmul.mubr.bf16.gmra.mrb[52].mxu0 %v1988_v15 }
 0x618   :  { %v1678_v60 = vpop.xlane.xlu0 %1677 }
 0x619   :  { %v1692_v33 = vmul.f32 0.0078125, %v1678_v60 }
 0x61a   :  { %v1680_v56 = vpop.xlane.xlu1 %1679 }
 0x61b   :  { %v4095_v52 = vsub.f32 %v4061_v42, %v1692_v33  ;;  %v1693_v47 = vmul.f32 0.0078125, %v1680_v56 }
 0x61c   :  { %v1674_v48 = vpop.xlane.xlu0 %1673 }
 0x61d   :  { %v4098_v57 = vsub.f32 %v4065_v29, %v1693_v47  ;;  %v1690_v6 = vmul.f32 0.0078125, %v1674_v48  ;;  %v1708_v14 = vmul.f32 %v4095_v52, %v4095_v52 }
 0x61e   :  { %v1676_v61 = vpop.xlane.xlu1 %1675 }
 0x61f   :  { %v4103_v59 = vsub.f32 %v4069_v8, %v1690_v6  ;;  %v1691_v37 = vmul.f32 0.0078125, %v1676_v61  ;;  %1718 = vadd.xlane.f32.xlu0 %v1708_v14  ;;  %v1709_v35 = vmul.f32 %v4098_v57, %v4098_v57  ;;  %v4146_v6 = vld [vmem:[#allocation5 + $0x15] ss:$0 sm:$0xff] }
 0x621   :  { %v4108_v42 = vsub.f32 %v4073_v26, %v1691_v37  ;;  %1720 = vadd.xlane.f32.xlu1 %v1709_v35  ;;  %v1706_v29 = vmul.f32 %v4103_v59, %v4103_v59  ;;  %v4149_v37 = vld [vmem:[#allocation5 + $0x17] ss:$0 sm:$0xff] }
 0x623   :  { %1714 = vadd.xlane.f32.xlu0 %v1706_v29  ;;  %v1707_v18 = vmul.f32 %v4108_v42, %v4108_v42  ;;  %v4151_v29 = vld [vmem:[#allocation5 + $0x16] ss:$0 sm:$0xff] }
 0x625   :  { %1716 = vadd.xlane.f32.xlu1 %v1707_v18 }
 0x629   :  { %v1682_v1 = vpop.xlane.xlu0 %1681 }
 0x62a   :  { %v1694_v8 = vmul.f32 0.0078125, %v1682_v1 }
 0x62b   :  { %v1684_v38 = vpop.xlane.xlu1 %1683 }
 0x62c   :  { %v4115_v43 = vsub.f32 %v4077_v62, %v1694_v8  ;;  %v1695_v41 = vmul.f32 0.0078125, %v1684_v38 }
 0x62d   :  { %v1686_v36 = vpop.xlane.xlu0 %1685 }
 0x62e   :  { %v4118_v26 = vsub.f32 %v4081_v4, %v1695_v41  ;;  %v1696_v46 = vmul.f32 0.0078125, %v1686_v36  ;;  %v1710_v28 = vmul.f32 %v4115_v43, %v4115_v43 }
 0x62f   :  { %v1688_v7 = vpop.xlane.xlu1 %1687 }
 0x630   :  { %v4123_v51 = vsub.f32 %v4085_v39, %v1696_v46  ;;  %v1697_v24 = vmul.f32 0.0078125, %v1688_v7  ;;  %1722 = vadd.xlane.f32.xlu0 %v1710_v28  ;;  %v1711_v31 = vmul.f32 %v4118_v26, %v4118_v26 }
 0x632   :  { %v4128_v62 = vsub.f32 %v4089_v13, %v1697_v24  ;;  %1724 = vadd.xlane.f32.xlu1 %v1711_v31  ;;  %v1712_v4 = vmul.f32 %v4123_v51, %v4123_v51 }
 0x634   :  { %1726 = vadd.xlane.f32.xlu0 %v1712_v4  ;;  %v1713_v16 = vmul.f32 %v4128_v62, %v4128_v62 }
 0x636   :  { %1728 = vadd.xlane.f32.xlu1 %v1713_v16 }
 0x684   :  { %v2520_v10 = vpop.f32.mrb[40].mxu0 }
 0x685   :  { %v2521_v39 = vpop.f32.mrb[41].mxu0 }
 0x686   :  { %v4134_v45 = vadd.f32 %v2521_v39, %v2520_v10  ;;  %v2523_v0 = vpop.f32.mrb[42].mxu0 }
 0x687   :  { %v2524_v17 = vpop.f32.mrb[43].mxu0 }
 0x688   :  { %v4136_v63 = vadd.f32 %v2524_v17, %v2523_v0 }
 0x68c   :  { %v2526_v50 = vpop.f32.mrb[44].mxu0 }
 0x68d   :  { %v2527_v13 = vpop.f32.mrb[45].mxu0 }
 0x68e   :  { %v2528_v11 = vadd.f32 %v2527_v13, %v2526_v50  ;;  %v2529_v54 = vpop.f32.mrb[46].mxu0 }
 0x68f   :  { %v2530_v53 = vpop.f32.mrb[47].mxu0 }
 0x690   :  { %v2531_v49 = vadd.f32 %v2530_v53, %v2529_v54  ;;  %v2166_v18 = vadd.f32 %v2528_v11, %v4149_v37 }
 0x692   :  { %v2169_v0 = vadd.f32 %v2531_v49, %v4149_v37 }
 0x694   :  { %v2532_v44 = vpop.f32.mrb[48].mxu0 }
 0x695   :  { %v2533_v32 = vpop.f32.mrb[49].mxu0 }
 0x696   :  { %v4138_v23 = vadd.f32 %v2533_v32, %v2532_v44  ;;  %v2535_v19 = vpop.f32.mrb[50].mxu0 }
 0x697   :  { %v2536_v5 = vpop.f32.mrb[51].mxu0 }
 0x698   :  { %v4140_v55 = vadd.f32 %v2536_v5, %v2535_v19  ;;  %v2161_v19 = vadd.f32 %v4136_v63, %v4149_v37  ;;  %v2174_v63 = vadd.f32 %v4138_v23, %v4149_v37 }
 0x69c   :  { %v2538_v9 = vpop.f32.mrb[52].mxu0 }
 0x69d   :  { %v2539_v25 = vpop.f32.mrb[53].mxu0 }
 0x69e   :  { %v4142_v58 = vadd.f32 %v2539_v25, %v2538_v9  ;;  %v2541_v22 = vpop.f32.mrb[54].mxu0 }
 0x69f   :  { %v2542_v40 = vpop.f32.mrb[55].mxu0 }
 0x6a0   :  { %v4144_v27 = vadd.f32 %v2542_v40, %v2541_v22  ;;  %v2182_v23 = vadd.f32 %v4142_v58, %v4149_v37 }
 0x6ac   :  { %v1719_v2 = vpop.xlane.xlu0 %1718 }
 0x6ad   :  { %v1732_v12 = vmul.f32 0.0078125, %v1719_v2 }
 0x6ae   :  { %v1721_v20 = vpop.xlane.xlu1 %1720 }
 0x6af   :  { %v1740_v3 = vadd.f32 1e-05, %v1732_v12  ;;  %v1733_v21 = vmul.f32 0.0078125, %v1721_v20 }
 0x6b0   :  { %v1715_v34 = vpop.xlane.xlu0 %1714 }
 0x6b1   :  { %2966 = vrsqrt.f32 %v1740_v3  ;;  %v1741_v15 = vadd.f32 1e-05, %v1733_v21  ;;  %v1730_v30 = vmul.f32 0.0078125, %v1715_v34 }
 0x6b2   :  { %v1717_v60 = vpop.xlane.xlu1 %1716 }
 0x6b3   :  { %2968 = vrsqrt.f32 %v1741_v15  ;;  %v1738_v33 = vadd.f32 1e-05, %v1730_v30  ;;  %v1731_v56 = vmul.f32 0.0078125, %v1717_v60  ;;  %v2177_v15 = vadd.f32 %v4140_v55, %v4149_v37 }
 0x6b5   :  { %2970 = vrsqrt.f32 %v1738_v33  ;;  %v1739_v47 = vadd.f32 1e-05, %v1731_v56 }
 0x6b7   :  { %2972 = vrsqrt.f32 %v1739_v47  ;;  %v2185_v47 = vadd.f32 %v4144_v27, %v4149_v37 }
 0x6bb   :  { %v2967_v48 = vpop.eup %2966 }
 0x6bc   :  { %v1756_v14 = vmul.f32 %v2967_v48, %v4095_v52 }
 0x6bd   :  { %v2969_v61 = vpop.eup %2968  ;;  %v1723_v35 = vpop.xlane.xlu0 %1722 }
 0x6be   :  { %v1734_v1 = vmul.f32 0.0078125, %v1723_v35  ;;  %v1768_v8 = vmul.f32 %v4146_v6, %v1756_v14  ;;  %v1757_v38 = vmul.f32 %v2969_v61, %v4098_v57 }
 0x6bf   :  { %v2971_v41 = vpop.eup %2970  ;;  %v1725_v36 = vpop.xlane.xlu1 %1724 }
 0x6c0   :  { %v1742_v46 = vadd.f32 1e-05, %v1734_v1  ;;  %v1735_v28 = vmul.f32 0.0078125, %v1725_v36  ;;  %v1780_v7 = vadd.f32 %v4151_v29, %v1768_v8  ;;  %v1769_v52 = vmul.f32 %v4146_v6, %v1757_v38 }
 0x6c1   :  { %v2973_v24 = vpop.eup %2972  ;;  %v1727_v31 = vpop.xlane.xlu0 %1726  ;;  %v1754_v4 = vmul.f32 %v2971_v41, %v4103_v59  ;;  %v2158_v59 = vadd.f32 %v4134_v45, %v4149_v37 }
 0x6c2   :  { %2974 = vrsqrt.f32 %v1742_v46  ;;  %v1743_v16 = vadd.f32 1e-05, %v1735_v28  ;;  %v1736_v10 = vmul.f32 0.0078125, %v1727_v31  ;;  %v2190_v39 = vadd.f32 %v2166_v18, %v1780_v7 }
 0x6c3   :  { %v1729_v17 = vpop.xlane.xlu1 %1728  ;;  %v1781_v57 = vadd.f32 %v4151_v29, %v1769_v52  ;;  %v1766_v50 = vmul.f32 %v4146_v6, %v1754_v4  ;;  %v1755_v13 = vmul.f32 %v2973_v24, %v4108_v42 }
 0x6c4   :  { %2976 = vrsqrt.f32 %v1743_v16  ;;  %v1744_v11 = vadd.f32 1e-05, %v1736_v10  ;;  %v1737_v54 = vmul.f32 0.0078125, %v1729_v17  ;;  %2200 = vadd.xlane.f32.xlu0 %v2190_v39 }
 0x6c5   :  { %v2191_v53 = vadd.f32 %v2169_v0, %v1781_v57  ;;  %v1778_v44 = vadd.f32 %v4151_v29, %v1766_v50  ;;  %v1767_v32 = vmul.f32 %v4146_v6, %v1755_v13 }
 0x6c6   :  { %2978 = vrsqrt.f32 %v1744_v11  ;;  %v1745_v49 = vadd.f32 1e-05, %v1737_v54 }
 0x6c7   :  { %2202 = vadd.xlane.f32.xlu1 %v2191_v53  ;;  %v2188_v5 = vadd.f32 %v2158_v59, %v1778_v44  ;;  %v1779_v42 = vadd.f32 %v4151_v29, %v1767_v32 }
 0x6c8   :  { %2980 = vrsqrt.f32 %v1745_v49 }
 0x6c9   :  { %2196 = vadd.xlane.f32.xlu0 %v2188_v5  ;;  %v2189_v9 = vadd.f32 %v2161_v19, %v1779_v42 }
 0x6cb   :  { %2198 = vadd.xlane.f32.xlu1 %v2189_v9 }
 0x6cc   :  { %v2975_v25 = vpop.eup %2974 }
 0x6cd   :  { %v1758_v45 = vmul.f32 %v2975_v25, %v4115_v43 }
 0x6ce   :  { %v2977_v22 = vpop.eup %2976 }
 0x6cf   :  { %v1770_v40 = vmul.f32 %v4146_v6, %v1758_v45  ;;  %v1759_v2 = vmul.f32 %v2977_v22, %v4118_v26 }
 0x6d0   :  { %v2979_v12 = vpop.eup %2978 }
 0x6d1   :  { %v1782_v20 = vadd.f32 %v4151_v29, %v1770_v40  ;;  %v1771_v3 = vmul.f32 %v4146_v6, %v1759_v2  ;;  %v1760_v21 = vmul.f32 %v2979_v12, %v4123_v51 }
 0x6d2   :  { %v2981_v34 = vpop.eup %2980 }
 0x6d3   :  { %v2192_v43 = vadd.f32 %v2174_v63, %v1782_v20  ;;  %v1783_v30 = vadd.f32 %v4151_v29, %v1771_v3  ;;  %v1772_v60 = vmul.f32 %v4146_v6, %v1760_v21  ;;  %v1761_v26 = vmul.f32 %v2981_v34, %v4128_v62 }
 0x6d5   :  { %2204 = vadd.xlane.f32.xlu0 %v2192_v43  ;;  %v2193_v33 = vadd.f32 %v2177_v15, %v1783_v30  ;;  %v1784_v56 = vadd.f32 %v4151_v29, %v1772_v60  ;;  %v1773_v51 = vmul.f32 %v4146_v6, %v1761_v26 }
 0x6d7   :  { %2206 = vadd.xlane.f32.xlu1 %v2193_v33  ;;  %v2194_v55 = vadd.f32 %v2182_v23, %v1784_v56  ;;  %v1785_v48 = vadd.f32 %v4151_v29, %v1773_v51 }
 0x6d9   :  { %2208 = vadd.xlane.f32.xlu0 %v2194_v55  ;;  %v2195_v14 = vadd.f32 %v2185_v47, %v1785_v48 }
 0x6db   :  { %2210 = vadd.xlane.f32.xlu1 %v2195_v14 }
 0x751   :  { %v2201_v62 = vpop.xlane.xlu0 %2200 }
 0x752   :  { %v2214_v61 = vmul.f32 0.0078125, %v2201_v62 }
 0x754   :  { %v2222_v35 = vsub.f32 %v2190_v39, %v2214_v61  ;;  %v2203_v58 = vpop.xlane.xlu1 %2202 }
 0x755   :  { %v2215_v18 = vmul.f32 0.0078125, %v2203_v58 }
 0x756   :  { %v2197_v1 = vpop.xlane.xlu0 %2196  ;;  %v2230_v8 = vmul.f32 %v2222_v35, %v2222_v35 }
 0x757   :  { %v2223_v38 = vsub.f32 %v2191_v53, %v2215_v18  ;;  %v2212_v41 = vmul.f32 0.0078125, %v2197_v1 }
 0x758   :  { %v2199_v36 = vpop.xlane.xlu1 %2198  ;;  %2240 = vadd.xlane.f32.xlu0 %v2230_v8 }
 0x759   :  { %v2220_v46 = vsub.f32 %v2188_v5, %v2212_v41  ;;  %v2213_v27 = vmul.f32 0.0078125, %v2199_v36  ;;  %v2231_v37 = vmul.f32 %v2223_v38, %v2223_v38 }
 0x75b   :  { %v4190_v28 = vsub.f32 %v2189_v9, %v2213_v27  ;;  %2242 = vadd.xlane.f32.xlu1 %v2231_v37  ;;  %v2228_v7 = vmul.f32 %v2220_v46, %v2220_v46 }
 0x75d   :  { %2236 = vadd.xlane.f32.xlu0 %v2228_v7  ;;  %v2229_v52 = vmul.f32 %v4190_v28, %v4190_v28 }
 0x75f   :  { %2238 = vadd.xlane.f32.xlu1 %v2229_v52 }
 0x762   :  { %v2205_v24 = vpop.xlane.xlu0 %2204 }
 0x763   :  { %v2216_v31 = vmul.f32 0.0078125, %v2205_v24 }
 0x764   :  { %v2207_v4 = vpop.xlane.xlu1 %2206 }
 0x765   :  { %v4194_v16 = vsub.f32 %v2192_v43, %v2216_v31  ;;  %v2217_v10 = vmul.f32 0.0078125, %v2207_v4 }
 0x766   :  { %v2209_v39 = vpop.xlane.xlu0 %2208 }
 0x767   :  { %v4196_v0 = vsub.f32 %v2193_v33, %v2217_v10  ;;  %v2218_v17 = vmul.f32 0.0078125, %v2209_v39  ;;  %v2232_v57 = vmul.f32 %v4194_v16, %v4194_v16 }
 0x768   :  { %v2211_v50 = vpop.xlane.xlu1 %2210 }
 0x769   :  { %v4200_v13 = vsub.f32 %v2194_v55, %v2218_v17  ;;  %v2219_v11 = vmul.f32 0.0078125, %v2211_v50  ;;  %2244 = vadd.xlane.f32.xlu0 %v2232_v57  ;;  %v2233_v54 = vmul.f32 %v4196_v0, %v4196_v0 }
 0x76b   :  { %v4204_v59 = vsub.f32 %v2195_v14, %v2219_v11  ;;  %2246 = vadd.xlane.f32.xlu1 %v2233_v54  ;;  %v2234_v53 = vmul.f32 %v4200_v13, %v4200_v13 }
 0x76d   :  { %2248 = vadd.xlane.f32.xlu0 %v2234_v53  ;;  %v2235_v44 = vmul.f32 %v4204_v59, %v4204_v59 }
 0x76f   :  { %2250 = vadd.xlane.f32.xlu1 %v2235_v44 }
 0x7e5   :  { %v2241_v32 = vpop.xlane.xlu0 %2240 }
 0x7e6   :  { %v2254_v49 = vmul.f32 0.0078125, %v2241_v32 }
 0x7e8   :  { %v2262_v19 = vadd.f32 1e-05, %v2254_v49  ;;  %v2243_v5 = vpop.xlane.xlu1 %2242 }
 0x7e9   :  { %v2255_v42 = vmul.f32 0.0078125, %v2243_v5 }
 0x7ea   :  { %2982 = vrsqrt.f32 %v2262_v19  ;;  %v2237_v9 = vpop.xlane.xlu0 %2236 }
 0x7eb   :  { %v2263_v25 = vadd.f32 1e-05, %v2255_v42  ;;  %v2252_v45 = vmul.f32 0.0078125, %v2237_v9 }
 0x7ec   :  { %v2239_v22 = vpop.xlane.xlu1 %2238 }
 0x7ed   :  { %2984 = vrsqrt.f32 %v2263_v25  ;;  %v2260_v40 = vadd.f32 1e-05, %v2252_v45  ;;  %v2253_v2 = vmul.f32 0.0078125, %v2239_v22 }
 0x7ef   :  { %2986 = vrsqrt.f32 %v2260_v40  ;;  %v2261_v12 = vadd.f32 1e-05, %v2253_v2 }
 0x7f1   :  { %2988 = vrsqrt.f32 %v2261_v12 }
 0x7f4   :  { %v2983_v63 = vpop.eup %2982 }
 0x7f5   :  { %v2278_v20 = vmul.f32 %v2983_v63, %v2222_v35 }
 0x7f6   :  { %v2245_v3 = vpop.xlane.xlu0 %2244 }
 0x7f7   :  { %v2985_v21 = vpop.eup %2984  ;;  %v2286_v34 = vmul.f32 %v4146_v6, %v2278_v20  ;;  %v2256_v15 = vmul.f32 0.0078125, %v2245_v3 }
 0x7f8   :  { %v2279_v43 = vmul.f32 %v2985_v21, %v2223_v38  ;;  %v2247_v30 = vpop.xlane.xlu1 %2246 }
 0x7f9   :  { %v2987_v60 = vpop.eup %2986  ;;  %v2294_v26 = vadd.f32 %v4151_v29, %v2286_v34  ;;  %v2264_v23 = vadd.f32 1e-05, %v2256_v15  ;;  %v2257_v33 = vmul.f32 0.0078125, %v2247_v30 }
 0x7fa   :  { %v2287_v56 = vmul.f32 %v4146_v6, %v2279_v43  ;;  %v2276_v51 = vmul.f32 %v2987_v60, %v2220_v46  ;;  %v2249_v47 = vpop.xlane.xlu0 %2248 }
 0x7fb   :  { %v2989_v55 = vpop.eup %2988  ;;  %2302 = vst [vmem:[#allocation13 + $0x10] sm:$0xff] %v2294_v26  ;;  %2990 = vrsqrt.f32 %v2264_v23  ;;  %v2265_v48 = vadd.f32 1e-05, %v2257_v33  ;;  %v2258_v14 = vmul.f32 0.0078125, %v2249_v47 }
 0x7fc   :  { %v2295_v62 = vadd.f32 %v4151_v29, %v2287_v56  ;;  %v2284_v61 = vmul.f32 %v4146_v6, %v2276_v51  ;;  %v2277_v35 = vmul.f32 %v2989_v55, %v4190_v28  ;;  %v2251_v58 = vpop.xlane.xlu1 %2250 }
 0x7fd   :  { %2992 = vrsqrt.f32 %v2265_v48  ;;  %v2266_v18 = vadd.f32 1e-05, %v2258_v14  ;;  %v2259_v1 = vmul.f32 0.0078125, %v2251_v58 }
 0x7fe   :  { %2303 = vst [vmem:[#allocation13 + $0x18] sm:$0xff] %v2295_v62  ;;  %v2292_v8 = vadd.f32 %v4151_v29, %v2284_v61  ;;  %v2285_v38 = vmul.f32 %v4146_v6, %v2277_v35 }
 0x7ff   :  { %2994 = vrsqrt.f32 %v2266_v18  ;;  %v2267_v41 = vadd.f32 1e-05, %v2259_v1 }
 0x800   :  { %2300 = vst [vmem:[#allocation13] sm:$0xff] %v2292_v8  ;;  %v2293_v36 = vadd.f32 %v4151_v29, %v2285_v38 }
 0x801   :  { %2996 = vrsqrt.f32 %v2267_v41 }
 0x802   :  { %2301 = vst [vmem:[#allocation13 + $0x8] sm:$0xff] %v2293_v36 }
 0x805   :  { %v2991_v46 = vpop.eup %2990 }
 0x806   :  { %v2280_v27 = vmul.f32 %v2991_v46, %v4194_v16 }
 0x807   :  { %v2993_v37 = vpop.eup %2992 }
 0x808   :  { %v2288_v28 = vmul.f32 %v4146_v6, %v2280_v27  ;;  %v2281_v7 = vmul.f32 %v2993_v37, %v4196_v0 }
 0x809   :  { %v2995_v52 = vpop.eup %2994 }
 0x80a   :  { %v2296_v24 = vadd.f32 %v4151_v29, %v2288_v28  ;;  %v2289_v31 = vmul.f32 %v4146_v6, %v2281_v7  ;;  %v2282_v4 = vmul.f32 %v2995_v52, %v4200_v13 }
 0x80b   :  { %v2997_v10 = vpop.eup %2996 }
 0x80c   :  { %2304 = vst [vmem:[#allocation13 + $0x20] sm:$0xff] %v2296_v24  ;;  %v2297_v39 = vadd.f32 %v4151_v29, %v2289_v31  ;;  %v2290_v17 = vmul.f32 %v4146_v6, %v2282_v4  ;;  %v2283_v16 = vmul.f32 %v2997_v10, %v4204_v59 }
 0x80e   :  { %2305 = vst [vmem:[#allocation13 + $0x28] sm:$0xff] %v2297_v39  ;;  %v2298_v0 = vadd.f32 %v4151_v29, %v2290_v17  ;;  %v2291_v57 = vmul.f32 %v4146_v6, %v2283_v16 }
 0x810   :  { %2306 = vst [vmem:[#allocation13 + $0x30] sm:$0xff] %v2298_v0  ;;  %v2299_v50 = vadd.f32 %v4151_v29, %v2291_v57 }
 0x812   :  { %2307 = vst [vmem:[#allocation13 + $0x38] sm:$0xff] %v2299_v50 }
 0x813   :  { %3143 = shalt.err (!%p3140_p10)
}
 0x814   :  { %s3144_s28 = scalar_lea.hbm %s4252_s6, 1024 }
 0x815   :  { %p3145_p11 = scmp.ne.s32.totalorder %s4252_s6, %s3144_s28  ;;  %p3148_p12 = scmp.lt.u32.totalorder %s3144_s28, %s4252_s6 }
 0x817   :  { %p3150_p13 = pnand %p3148_p12, %p3145_p11 }
 0x819   :  { %3153 = shalt.err (!%p3150_p13)
}
 0x81a   :  { %2319 = dma.vmem_to_hbm [thread:$0]  %s2314_s22, 1024, %s4252_s6, [#allocation4], %s3166_s9, %s3166_s9, %s3167_s10  }
 0x81b   :  { %3162 = dma.done.wait [#allocation4], 1024  }
 0x81c   :  { %3163 = vsyncadd [#allocation4], 4294966272 }
 0x81d   :  { %2323 = vsyncpa [#allocation3], 1 }
 0x81e   :  { %2324 = vsyncpa [#allocation6], 1 }
 0x81f   :  { %2325 = vsyncpa [#allocation9], 1 }
 0x820   :  { %2326 = vsyncpa [#allocation12], 1 }
 0x821   :  { %2327 = vsyncpa [#allocation4], 1 }

</bundles_post_ra>
